<compile_context>
chip_gen: v7x
topology: tpu7x:2x2x1
jax: 0.10.0
libtpu: 0.0.40
codegen_flags: <defaults>
</compile_context>

<pallas_src>
import jax
import jax.numpy as jnp
from jax import lax
from jax.experimental import pallas as pl
from jax.experimental.pallas import tpu as pltpu

# ----------------------------- sizes (small, consistent with the module) ----
B = 2            # batch
CIN = 4          # input channels (stand-in for RGB=3)
H = W = 14       # feature spatial size (AvgPool2d(14, stride=1) -> 1x1)
S = H * W        # 196 ; B*S = 392 = 49*8 (sublane aligned)
C_TRUNK = 64     # stand-in for 1024 trunk channels
C_FEAT = 128     # stand-in for 2048 branch channels
N_SUP = 8        # num_classes['sup']
N_SUB = 16       # num_classes['sub']
LANE = 128       # TPU lane width; head outputs padded to this for unmasked stores


def resnet_embed_kernel(
    x_ref,                      # (B*S, CIN)            bf16  (batch collapsed into rows)
    wt_ref, bt_ref,             # trunk 1x1 conv:       (CIN, C_TRUNK) bf16, (1, C_TRUNK) f32
    wb3_ref, bb3_ref,           # fused branches:       (C_TRUNK, 3*C_FEAT) bf16, (1, 3*C_FEAT) f32
    pool_ref,                   # (B, B*S) f32 block-diagonal 1/S pooling matrix
    wfp_ref, bfp_ref,           # fc_prior, cols padded to LANE: (C_FEAT, LANE), (1, LANE) f32
    wg_ref, bg_ref,             # guide fc, rows padded to LANE: (LANE, C_FEAT), (1, C_FEAT) f32
    whead_ref, bhead_ref,       # fused inferior heads /3, cols padded: (2*C_FEAT, LANE), (1, LANE)
    sp_ref,                     # (B, LANE) f32 out (lanes [0:N_SUP] valid)
    si_ref,                     # (B, LANE) f32 out (lanes [0:N_SUB] valid)
):
    # ---- trunk stand-in: 1x1 conv (channel matmul) + ReLU -------------------
    # TODO(synk): real ResNet(Bottleneck, [3,4,6]) trunk (source not provided).
    fs = jnp.maximum(
        jnp.dot(x_ref[...], wt_ref[...], preferred_element_type=jnp.float32)
        + bt_ref[...], 0.0)                                        # (B*S, C_TRUNK) f32

    # ---- three branches fused into one 384-wide bf16 MXU matmul -------------
    # TODO(synk): real Branch(level) sub-modules (source not provided).
    br = jnp.maximum(
        jnp.dot(fs.astype(jnp.bfloat16), wb3_ref[...],
                preferred_element_type=jnp.float32)
        + bb3_ref[...], 0.0)                                       # (B*S, 3*C_FEAT) f32

    # ---- all three spatial poolings as ONE MXU matmul ------------------------
    # pool_ref is block-diagonal with 1/S entries -> per-batch spatial means.
    pooled = jnp.dot(pool_ref[...], br,
                     preferred_element_type=jnp.float32)           # (B, 3*C_FEAT) f32
    fp_pool = pooled[:, 0 * C_FEAT:1 * C_FEAT]                     # avgpool(14)(fp)
    fi1_mean = pooled[:, 1 * C_FEAT:2 * C_FEAT]                    # mean_s(fi_1)
    fi2_pool = pooled[:, 2 * C_FEAT:3 * C_FEAT]                    # avgpool(14)(fi_2)

    # ---- prior head: sp = fc_prior(fp_pool), lane-padded to 128 --------------
    sp_pad = jnp.dot(fp_pool, wfp_ref[...],
                     preferred_element_type=jnp.float32) + bfp_ref[...]   # (B, LANE)
    sp_ref[...] = sp_pad                                           # unmasked 128-lane store

    # ---- softmax over the N_SUP real classes (padded lanes masked out) -------
    lane_ix = lax.broadcasted_iota(jnp.int32, sp_pad.shape, 1)
    valid = lane_ix < N_SUP
    logits = jnp.where(valid, sp_pad, -1e30)
    m = jnp.max(logits, axis=1, keepdims=True)
    e = jnp.exp(logits - m)                                        # exactly 0 on padded lanes
    sp_sm = e * pl.reciprocal(jnp.sum(e, axis=1, keepdims=True), approx=True)

    # ---- EmbedGuiding stand-in: sigmoid(fc(softmax scores)) channel gate ------
    # TODO(synk): real EmbedGuiding (embed + concat + conv) (source not provided).
    g = jnp.dot(sp_sm, wg_ref[...],
                preferred_element_type=jnp.float32) + bg_ref[...]  # (B, C_FEAT)
    att = pl.reciprocal(1.0 + jnp.exp(-g), approx=True)            # sigmoid via EUP

    # ---- guided sum-pool without a (B,S,C) intermediate:
    #      sum_s(fi1 * att) == att * sum_s(fi1) == att * (S * mean_s(fi1))
    fi1_pooled = att * (fi1_mean * jnp.float32(S))                 # (B, C_FEAT)

    # ---- fused inferior heads: (si_1 + si_2 + si_cat) / 3 ---------------------
    fi_cat = jnp.concatenate([fi1_pooled, fi2_pool], axis=1)       # (B, 2*C_FEAT)
    si_ref[...] = (jnp.dot(fi_cat, whead_ref[...],
                           preferred_element_type=jnp.float32) + bhead_ref[...])


@jax.jit
def resnet_embed_forward(x_nchw, params):
    """x_nchw: (B, CIN, H, W) float32, like the PyTorch module's input."""
    b, cin, h, w = x_nchw.shape
    s = h * w
    # NCHW -> channels-last, batch collapsed into 8-aligned rows, bf16 MXU operand.
    x_rows = jnp.transpose(x_nchw, (0, 2, 3, 1)).reshape(b * s, cin).astype(jnp.bfloat16)

    # ---- wrapper-side weight fusion / padding (pure layout prep, constant under jit) ----
    wt = params['wt'].astype(jnp.bfloat16)
    bt = params['bt']
    wb3 = jnp.concatenate([params['wbp'], params['wbi1'], params['wbi2']],
                          axis=1).astype(jnp.bfloat16)             # (C_TRUNK, 3*C_FEAT)
    bb3 = jnp.concatenate([params['bbp'], params['bbi1'], params['bbi2']], axis=1)
    # block-diagonal (B, B*S) pooling matrix with 1/S entries
    pool = jnp.kron(jnp.eye(b, dtype=jnp.float32),
                    jnp.full((1, s), 1.0 / s, jnp.float32))
    # fc_prior padded to 128 output lanes
    wfp_pad = jnp.pad(params['wfp'], ((0, 0), (0, LANE - N_SUP)))
    bfp_pad = jnp.pad(params['bfp'], ((0, 0), (0, LANE - N_SUP)))
    # guide fc padded to 128 input rows (extra rows are multiplied by zero softmax lanes)
    wg_pad = jnp.pad(params['wg'], ((0, LANE - N_SUP), (0, 0)))
    bg = params['bg']
    # fused inferior heads, /3 folded into weights/bias, padded to 128 output lanes
    whead = jnp.concatenate(
        [params['wfi1'] + params['wcat'][:C_FEAT],
         params['wfi2'] + params['wcat'][C_FEAT:]], axis=0) / 3.0   # (2*C_FEAT, N_SUB)
    bhead = (params['bfi1'] + params['bfi2'] + params['bcat']) / 3.0
    whead_pad = jnp.pad(whead, ((0, 0), (0, LANE - N_SUB)))
    bhead_pad = jnp.pad(bhead, ((0, 0), (0, LANE - N_SUB)))

    args = (x_rows, wt, bt, wb3, bb3, pool,
            wfp_pad, bfp_pad, wg_pad, bg, whead_pad, bhead_pad)
    vmem = pl.BlockSpec(memory_space=pltpu.MemorySpace.VMEM)
    sp_pad, si_pad = pl.pallas_call(
        resnet_embed_kernel,
        out_shape=(jax.ShapeDtypeStruct((b, LANE), jnp.float32),
                   jax.ShapeDtypeStruct((b, LANE), jnp.float32)),
        in_specs=[vmem] * len(args),
        out_specs=(vmem, vmem),
    )(*args)
    return sp_pad[:, :N_SUP], si_pad[:, :N_SUB]


def reference_forward(x_nchw, p, mxu_dtype=jnp.float32):
    """Pure-JAX reference (original unfused structure).

    mxu_dtype=bfloat16 mirrors the kernel's MXU-operand precision policy (tight check);
    mxu_dtype=float32 is the full-precision spec (loose check bounding bf16 drift).
    """
    b, c, h, w = x_nchw.shape
    d = mxu_dtype
    x = jnp.transpose(x_nchw, (0, 2, 3, 1)).reshape(b, h * w, c)
    mm = lambda a, w_: jnp.einsum('bsc,co->bso', a.astype(d), w_.astype(d),
                                  preferred_element_type=jnp.float32)
    fs = jax.nn.relu(mm(x, p['wt']) + p['bt'])
    fp = jax.nn.relu(mm(fs, p['wbp']) + p['bbp'])
    fi1 = jax.nn.relu(mm(fs, p['wbi1']) + p['bbi1'])
    fi2 = jax.nn.relu(mm(fs, p['wbi2']) + p['bbi2'])
    fp_pool = jnp.mean(fp, axis=1)
    sp = fp_pool @ p['wfp'] + p['bfp']
    sp_sm = jax.nn.softmax(sp, axis=1)
    att = jax.nn.sigmoid(sp_sm @ p['wg'] + p['bg'])
    fi1_pooled = jnp.sum(fi1 * att[:, None, :], axis=1)
    si1 = fi1_pooled @ p['wfi1'] + p['bfi1']
    fi2_pooled = jnp.mean(fi2, axis=1)
    si2 = fi2_pooled @ p['wfi2'] + p['bfi2']
    si_cat = jnp.concatenate([fi1_pooled, fi2_pooled], axis=1) @ p['wcat'] + p['bcat']
    return sp, (si1 + si2 + si_cat) / 3.0


def make_params(key):
    def dense(k, fan_in, fan_out):
        kw, kb = jax.random.split(k)
        scale = 1.0 / jnp.sqrt(jnp.float32(fan_in))
        w = jax.random.uniform(kw, (fan_in, fan_out), jnp.float32, -scale, scale)
        b = jax.random.uniform(kb, (1, fan_out), jnp.float32, -scale, scale)
        return w, b

    ks = jax.random.split(key, 9)
    p = {}
    p['wt'],   p['bt']   = dense(ks[0], CIN, C_TRUNK)
    p['wbp'],  p['bbp']  = dense(ks[1], C_TRUNK, C_FEAT)
    p['wbi1'], p['bbi1'] = dense(ks[2], C_TRUNK, C_FEAT)
    p['wbi2'], p['bbi2'] = dense(ks[3], C_TRUNK, C_FEAT)
    p['wfp'],  p['bfp']  = dense(ks[4], C_FEAT, N_SUP)
    p['wg'],   p['bg']   = dense(ks[5], N_SUP, C_FEAT)
    p['wfi1'], p['bfi1'] = dense(ks[6], C_FEAT, N_SUB)
    p['wfi2'], p['bfi2'] = dense(ks[7], C_FEAT, N_SUB)
    p['wcat'], p['bcat'] = dense(ks[8], 2 * C_FEAT, N_SUB)
    return p


if __name__ == "__main__":
    key = jax.random.PRNGKey(0)
    kx, kp = jax.random.split(key)
    x = jax.random.normal(kx, (B, CIN, H, W), jnp.float32)   # NCHW, like PyTorch
    params = make_params(kp)

    sp, si_avg = jax.block_until_ready(resnet_embed_forward(x, params))
    assert sp.shape == (B, N_SUP) and si_avg.shape == (B, N_SUB)

    # 1) structural correctness vs a reference using the SAME bf16-MXU-operand policy
    sp_m, si_m = reference_forward(x, params, mxu_dtype=jnp.bfloat16)
    assert jnp.allclose(sp, sp_m, rtol=1e-2, atol=5e-2), "sp mismatch vs matched-precision ref"
    assert jnp.allclose(si_avg, si_m, rtol=1e-2, atol=5e-2), "si_avg mismatch vs matched-precision ref"

    # 2) full-f32 reference: bounds the bf16 MXU drift (looser tolerances)
    sp_f, si_f = reference_forward(x, params, mxu_dtype=jnp.float32)
    assert jnp.allclose(sp, sp_f, rtol=5e-2, atol=5e-2), "sp drift vs f32 ref"
    assert jnp.allclose(si_avg, si_f, rtol=5e-2, atol=7.5e-1), "si_avg drift vs f32 ref"

    print("KERNEL_OK")
</pallas_src>

<mosaic_0001>
module attributes {stable_mosaic.version = 11 : i64} {
  func.func @resnet_embed_kernel(%arg0: memref<392x4xbf16, #tpu.memory_space<vmem>>, %arg1: memref<4x64xbf16, #tpu.memory_space<vmem>>, %arg2: memref<1x64xf32, #tpu.memory_space<vmem>>, %arg3: memref<64x384xbf16, #tpu.memory_space<vmem>>, %arg4: memref<1x384xf32, #tpu.memory_space<vmem>>, %arg5: memref<2x392xf32, #tpu.memory_space<vmem>>, %arg6: memref<128x128xf32, #tpu.memory_space<vmem>>, %arg7: memref<1x128xf32, #tpu.memory_space<vmem>>, %arg8: memref<128x128xf32, #tpu.memory_space<vmem>>, %arg9: memref<1x128xf32, #tpu.memory_space<vmem>>, %arg10: memref<256x128xf32, #tpu.memory_space<vmem>>, %arg11: memref<1x128xf32, #tpu.memory_space<vmem>>, %arg12: memref<2x128xf32, #tpu.memory_space<vmem>>, %arg13: memref<2x128xf32, #tpu.memory_space<vmem>>) attributes {dimension_semantics = [], scalar_prefetch = 0 : i64, scratch_operands = 0 : i64, tpu.core_type = #tpu.core_type<tc>} {
    %c0 = arith.constant 0 : index
    %c0_0 = arith.constant 0 : index
    %0 = vector.load %arg0[%c0, %c0_0] : memref<392x4xbf16, #tpu.memory_space<vmem>>, vector<392x4xbf16>
    %c0_1 = arith.constant 0 : index
    %c0_2 = arith.constant 0 : index
    %1 = vector.load %arg1[%c0_1, %c0_2] : memref<4x64xbf16, #tpu.memory_space<vmem>>, vector<4x64xbf16>
    %cst = arith.constant dense<0.000000e+00> : vector<392x64xf32>
    %2 = tpu.matmul %0, %1, %cst {dimension_numbers = #tpu.dot_dimension_numbers<[1], [0], [0], [1], [0, 0, 1, 1], [], []>} : vector<392x4xbf16>, vector<4x64xbf16>, vector<392x64xf32> -> vector<392x64xf32>
    %c0_3 = arith.constant 0 : index
    %c0_4 = arith.constant 0 : index
    %3 = vector.load %arg2[%c0_3, %c0_4] : memref<1x64xf32, #tpu.memory_space<vmem>>, vector<1x64xf32>
    %4 = vector.broadcast %3 : vector<1x64xf32> to vector<392x64xf32>
    %5 = arith.addf %2, %4 : vector<392x64xf32>
    %cst_5 = arith.constant 0.000000e+00 : f32
    %6 = vector.broadcast %cst_5 : f32 to vector<392x64xf32>
    %7 = arith.maximumf %5, %6 : vector<392x64xf32>
    %8 = arith.truncf %7 : vector<392x64xf32> to vector<392x64xbf16>
    %c0_6 = arith.constant 0 : index
    %c0_7 = arith.constant 0 : index
    %9 = vector.load %arg3[%c0_6, %c0_7] : memref<64x384xbf16, #tpu.memory_space<vmem>>, vector<64x384xbf16>
    %cst_8 = arith.constant dense<0.000000e+00> : vector<392x384xf32>
    %10 = tpu.matmul %8, %9, %cst_8 {dimension_numbers = #tpu.dot_dimension_numbers<[1], [0], [0], [1], [0, 0, 1, 1], [], []>} : vector<392x64xbf16>, vector<64x384xbf16>, vector<392x384xf32> -> vector<392x384xf32>
    %c0_9 = arith.constant 0 : index
    %c0_10 = arith.constant 0 : index
    %11 = vector.load %arg4[%c0_9, %c0_10] : memref<1x384xf32, #tpu.memory_space<vmem>>, vector<1x384xf32>
    %12 = vector.broadcast %11 : vector<1x384xf32> to vector<392x384xf32>
    %13 = arith.addf %10, %12 : vector<392x384xf32>
    %cst_11 = arith.constant 0.000000e+00 : f32
    %14 = vector.broadcast %cst_11 : f32 to vector<392x384xf32>
    %15 = arith.maximumf %13, %14 : vector<392x384xf32>
    %c0_12 = arith.constant 0 : index
    %c0_13 = arith.constant 0 : index
    %16 = vector.load %arg5[%c0_12, %c0_13] : memref<2x392xf32, #tpu.memory_space<vmem>>, vector<2x392xf32>
    %cst_14 = arith.constant dense<0.000000e+00> : vector<2x384xf32>
    %17 = tpu.matmul %16, %15, %cst_14 {dimension_numbers = #tpu.dot_dimension_numbers<[1], [0], [0], [1], [0, 0, 1, 1], [], []>} : vector<2x392xf32>, vector<392x384xf32>, vector<2x384xf32> -> vector<2x384xf32>
    %18 = vector.extract_strided_slice %17 {offsets = [0, 0], sizes = [2, 128], strides = [1, 1]} : vector<2x384xf32> to vector<2x128xf32>
    %19 = vector.extract_strided_slice %17 {offsets = [0, 128], sizes = [2, 128], strides = [1, 1]} : vector<2x384xf32> to vector<2x128xf32>
    %20 = vector.extract_strided_slice %17 {offsets = [0, 256], sizes = [2, 128], strides = [1, 1]} : vector<2x384xf32> to vector<2x128xf32>
    %c0_15 = arith.constant 0 : index
    %c0_16 = arith.constant 0 : index
    %21 = vector.load %arg6[%c0_15, %c0_16] : memref<128x128xf32, #tpu.memory_space<vmem>>, vector<128x128xf32>
    %cst_17 = arith.constant dense<0.000000e+00> : vector<2x128xf32>
    %22 = tpu.matmul %18, %21, %cst_17 {dimension_numbers = #tpu.dot_dimension_numbers<[1], [0], [0], [1], [0, 0, 1, 1], [], []>} : vector<2x128xf32>, vector<128x128xf32>, vector<2x128xf32> -> vector<2x128xf32>
    %c0_18 = arith.constant 0 : index
    %c0_19 = arith.constant 0 : index
    %23 = vector.load %arg7[%c0_18, %c0_19] : memref<1x128xf32, #tpu.memory_space<vmem>>, vector<1x128xf32>
    %24 = vector.broadcast %23 : vector<1x128xf32> to vector<2x128xf32>
    %25 = arith.addf %22, %24 : vector<2x128xf32>
    %c0_20 = arith.constant 0 : index
    %c0_21 = arith.constant 0 : index
    %26 = vector.load %arg12[%c0_20, %c0_21] : memref<2x128xf32, #tpu.memory_space<vmem>>, vector<2x128xf32>
    tpu.vector_store %arg12[%c0_20, %c0_21], %25 {strides = array<i32>} : memref<2x128xf32, #tpu.memory_space<vmem>>, vector<2x128xf32>,
    %27 = tpu.iota {dimensions = array<i32: 1>} : vector<2x128xi32>
    %c8_i32 = arith.constant 8 : i32
    %28 = vector.broadcast %c8_i32 : i32 to vector<2x128xi32>
    %29 = arith.cmpi slt, %27, %28 : vector<2x128xi32>
    %cst_22 = arith.constant -1.000000e+30 : f32
    %30 = vector.broadcast %cst_22 : f32 to vector<2x128xf32>
    %31 = arith.select %29, %25, %30 : vector<2x128xi1>, vector<2x128xf32>
    %cst_23 = arith.constant dense<0xFF800000> : vector<2xf32>
    %32 = vector.multi_reduction <maximumf>, %31, %cst_23 [1] : vector<2x128xf32> to vector<2xf32>
    %33 = vector.shape_cast %32 : vector<2xf32> to vector<2x1xf32>
    %34 = vector.broadcast %33 : vector<2x1xf32> to vector<2x128xf32>
    %35 = arith.subf %31, %34 : vector<2x128xf32>
    %36 = math.exp %35 : vector<2x128xf32>
    %cst_24 = arith.constant dense<0.000000e+00> : vector<2xf32>
    %37 = vector.multi_reduction <add>, %36, %cst_24 [1] : vector<2x128xf32> to vector<2xf32>
    %38 = vector.shape_cast %37 : vector<2xf32> to vector<2x1xf32>
    %39 = tpu.reciprocal %38 {approx = true} : vector<2x1xf32> -> vector<2x1xf32>
    %40 = vector.broadcast %39 : vector<2x1xf32> to vector<2x128xf32>
    %41 = arith.mulf %36, %40 : vector<2x128xf32>
    %c0_25 = arith.constant 0 : index
    %c0_26 = arith.constant 0 : index
    %42 = vector.load %arg8[%c0_25, %c0_26] : memref<128x128xf32, #tpu.memory_space<vmem>>, vector<128x128xf32>
    %cst_27 = arith.constant dense<0.000000e+00> : vector<2x128xf32>
    %43 = tpu.matmul %41, %42, %cst_27 {dimension_numbers = #tpu.dot_dimension_numbers<[1], [0], [0], [1], [0, 0, 1, 1], [], []>} : vector<2x128xf32>, vector<128x128xf32>, vector<2x128xf32> -> vector<2x128xf32>
    %c0_28 = arith.constant 0 : index
    %c0_29 = arith.constant 0 : index
    %44 = vector.load %arg9[%c0_28, %c0_29] : memref<1x128xf32, #tpu.memory_space<vmem>>, vector<1x128xf32>
    %45 = vector.broadcast %44 : vector<1x128xf32> to vector<2x128xf32>
    %46 = arith.addf %43, %45 : vector<2x128xf32>
    %cst_30 = arith.constant 0.000000e+00 : f32
    %47 = vector.broadcast %cst_30 : f32 to vector<2x128xf32>
    %48 = arith.subf %47, %46 : vector<2x128xf32>
    %49 = math.exp %48 : vector<2x128xf32>
    %cst_31 = arith.constant 1.000000e+00 : f32
    %50 = vector.broadcast %cst_31 : f32 to vector<2x128xf32>
    %51 = arith.addf %50, %49 : vector<2x128xf32>
    %52 = tpu.reciprocal %51 {approx = true} : vector<2x128xf32> -> vector<2x128xf32>
    %cst_32 = arith.constant 1.960000e+02 : f32
    %53 = vector.broadcast %cst_32 : f32 to vector<2x128xf32>
    %54 = arith.mulf %19, %53 : vector<2x128xf32>
    %55 = arith.mulf %52, %54 : vector<2x128xf32>
    %56 = tpu.concatenate %55, %20 in 1 : vector<2x128xf32>, vector<2x128xf32> -> vector<2x256xf32>
    %c0_33 = arith.constant 0 : index
    %c0_34 = arith.constant 0 : index
    %57 = vector.load %arg10[%c0_33, %c0_34] : memref<256x128xf32, #tpu.memory_space<vmem>>, vector<256x128xf32>
    %cst_35 = arith.constant dense<0.000000e+00> : vector<2x128xf32>
    %58 = tpu.matmul %56, %57, %cst_35 {dimension_numbers = #tpu.dot_dimension_numbers<[1], [0], [0], [1], [0, 0, 1, 1], [], []>} : vector<2x256xf32>, vector<256x128xf32>, vector<2x128xf32> -> vector<2x128xf32>
    %c0_36 = arith.constant 0 : index
    %c0_37 = arith.constant 0 : index
    %59 = vector.load %arg11[%c0_36, %c0_37] : memref<1x128xf32, #tpu.memory_space<vmem>>, vector<1x128xf32>
    %60 = vector.broadcast %59 : vector<1x128xf32> to vector<2x128xf32>
    %61 = arith.addf %58, %60 : vector<2x128xf32>
    %c0_38 = arith.constant 0 : index
    %c0_39 = arith.constant 0 : index
    %62 = vector.load %arg13[%c0_38, %c0_39] : memref<2x128xf32, #tpu.memory_space<vmem>>, vector<2x128xf32>
    tpu.vector_store %arg13[%c0_38, %c0_39], %61 {strides = array<i32>} : memref<2x128xf32, #tpu.memory_space<vmem>>, vector<2x128xf32>,
    return
  }
}

</mosaic_0001>

<bundles_post_ra>
// kernel: resnet_embed_forward.1
= control target key start
LH: loop header
LB: loop body
LE: loop exit
PB: predicated region body
PF: predicated region fallthrough
CT: control target
= control target key end

     0   :  { %19 = vsyncpa [#allocation3], 0  ;;  %vm302_vm0 = vcmask 1041408   ;;  %v2997_v1 = vmov 0.0   ;;  %vm2998_vm1 = vmmov 0   ;;  %vm226_vm2 = vcmask 31744   ;;  %s3976_s0 = inlined_call_operand.vmem [shape: bf16[392,4], index: 0, kind: input, shape index: {}]   ;;  %s3977_s1 = inlined_call_operand.vmem [shape: bf16[4,64], index: 1, kind: input, shape index: {}]   ;;  %s3978_s2 = inlined_call_operand.vmem [shape: f32[1,64], index: 2, kind: input, shape index: {}]   ;;  %s3979_s3 = inlined_call_operand.vmem [shape: bf16[64,384], index: 3, kind: input, shape index: {}]   ;;  %s3980_s4 = inlined_call_operand.vmem [shape: f32[1,384], index: 4, kind: input, shape index: {}]   ;;  %s3981_s5 = inlined_call_operand.vmem [shape: f32[2,392], index: 5, kind: input, shape index: {}]   ;;  %s3982_s6 = inlined_call_operand.vmem [shape: f32[128,128], index: 6, kind: input, shape index: {}]   ;;  %s3983_s7 = inlined_call_operand.vmem [shape: f32[1,128], index: 7, kind: input, shape index: {}]   ;;  %s3984_s8 = inlined_call_operand.vmem [shape: f32[128,128], index: 8, kind: input, shape index: {}]   ;;  %s3985_s9 = inlined_call_operand.vmem [shape: f32[1,128], index: 9, kind: input, shape index: {}]   ;;  %s3986_s10 = inlined_call_operand.vmem [shape: f32[256,128], index: 10, kind: input, shape index: {}]   ;;  %s3987_s11 = inlined_call_operand.vmem [shape: f32[1,128], index: 11, kind: input, shape index: {}]   ;;  %s3988_s12 = inlined_call_operand.hbm [shape: f32[2,128], index: 12, kind: output, shape index: {0}]   ;;  %s3989_s13 = inlined_call_operand.hbm [shape: f32[2,128], index: 13, kind: output, shape index: {1}]  }
   0x1   :  { %v95_v0 = vld [vmem:[%s3977_s1] sm:$0x3]  ;;  %2376 = vmatprep.subr.bf16.mxu0 %v2997_v1  ;;  %2378 = vmatprep.mubr.msk.bf16.mxu0 %vm2998_vm1, %v2997_v1  ;;  %v2900_v4 = vld [vmem:[%s3976_s0 + $0x8] sm:$0xff]   ;;  %v2901_v5 = vld [vmem:[%s3976_s0 + $0x10] sm:$0xff]  }
   0x2   :  { %v304_v2 = vsel %vm302_vm0, %v95_v0, 0  ;;  %v2899_v3 = vld [vmem:[%s3976_s0] sm:$0xff]   ;;  %2888 = vmatprep.subr.bf16.mxu1 %v2997_v1  ;;  %2470 = vmatprep.mubr.msk.bf16.mxu1 %vm2998_vm1, %v2997_v1  ;;  %v2902_v6 = vld [vmem:[%s3976_s0 + $0x18] sm:$0xff]  }
   0x3   :  { %2377 = vmatpush3.bf16.msra.mxu0 %v304_v2  ;;  %2889 = vmatpush3.bf16.msra.mxu1 %v304_v2 }
   0x4   :  { %2478 = vmatprep.subr.bf16.mxu0 %v2997_v1 }
   0x6   :  { %2379 = vmatmul.mubr.msk.bf16.vlgmr.msra.gmra.mrb[0].mxu0 %vm226_vm2, %v2899_v3 }
   0x7   :  { %2382 = vmatprep.mubr.msk.bf16.mxu0 %vm2998_vm1, %v2997_v1 }
   0xe   :  { %2383 = vmatmul.mubr.msk.bf16.gmra.mrb[4].mxu0 %vm226_vm2, %v2900_v4 }
   0xf   :  { %2386 = vmatprep.mubr.msk.bf16.mxu0 %vm2998_vm1, %v2997_v1 }
  0x16   :  { %2387 = vmatmul.mubr.msk.bf16.gmra.mrb[8].mxu0 %vm226_vm2, %v2901_v5 }
  0x17   :  { %2390 = vmatprep.mubr.msk.bf16.mxu0 %vm2998_vm1, %v2997_v1 }
  0x1e   :  { %2391 = vmatmul.mubr.msk.bf16.gmra.mrb[12].mxu0 %vm226_vm2, %v2902_v6 }
  0x1f   :  { %20 = vsyncpa [#allocation5], 0  ;;  %2394 = vmatprep.mubr.msk.bf16.mxu0 %vm2998_vm1, %v2997_v1  ;;  %v2903_v7 = vld [vmem:[%s3976_s0 + $0x20] sm:$0xff]   ;;  %v2904_v8 = vld [vmem:[%s3976_s0 + $0x28] sm:$0xff]   ;;  %v2999_v29 = vmov 0   ;;  %vm709_vm3 = vcmask 523264  }
  0x20   :  { %v2905_v9 = vld [vmem:[%s3976_s0 + $0x30] sm:$0xff]   ;;  %v2922_v10 = vld [vmem:[%s3976_s0 + $0xb8] sm:$0xff]   ;;  %v2924_v11 = vld [vmem:[%s3979_s3] ss:$12 sps:$4 sm:$0xff]   ;;  %vm1467_vm4 = vcmask 64512  }
  0x21   :  { %v2926_v12 = vld [vmem:[%s3979_s3 + $0x4] ss:$12 sps:$4 sm:$0xff]   ;;  %v2927_v13 = vld [vmem:[%s3979_s3 + $0x8] ss:$12 sps:$4 sm:$0xff]   ;;  %2471 = vmatmul.mubr.msk.bf16.vlgmr.msra.gmra.mrb[0].mxu1 %vm226_vm2, %v2922_v10  ;;  %v2906_v15 = vld [vmem:[%s3976_s0 + $0x38] sm:$0xff]  }
  0x22   :  { %v2930_v14 = vld [vmem:[%s3979_s3 + $0x1c] ss:$12 sps:$4 sm:$0xff]   ;;  %2474 = vmatprep.mubr.msk.bf16.mxu1 %vm2998_vm1, %v2997_v1  ;;  %785 = vmatprep.subr.bf16.mxu1 %v2926_v12  ;;  %v2928_v16 = vld [vmem:[%s3979_s3 + $0x18] ss:$12 sps:$4 sm:$0xff]   ;;  %v2931_v17 = vld [vmem:[%s3979_s3 + $0x20] ss:$12 sps:$4 sm:$0xff]  }
  0x23   :  { %786 = vmatpush1.bf16.msra.mxu1 %v2924_v11  ;;  %2479 = vmatpush3.bf16.msra.mxu0 %v2927_v13  ;;  %v2923_v18 = vld [vmem:[%s3976_s0 + $0xc0] ss:$0 sps:$4 sm:$0xff]   ;;  %v2908_v20 = vld [vmem:[%s3976_s0 + $0x48] sm:$0xff]   ;;  %v2909_v21 = vld [vmem:[%s3976_s0 + $0x50] sm:$0xff]  }
  0x24   :  { %787 = vmatprep.subr.bf16.mxu1 %v2930_v14  ;;  %2480 = vmatprep.subr.bf16.mxu0 %v2997_v1  ;;  %v2907_v19 = vld [vmem:[%s3976_s0 + $0x40] sm:$0xff]   ;;  %v2932_v23 = vld [vmem:[%s3979_s3 + $0x30] ss:$12 sps:$4 sm:$0xff]   ;;  %v2938_v26 = vld [vmem:[%s3979_s3 + $0x4c] ss:$12 sps:$4 sm:$0xff]  }
  0x25   :  { %v2934_v22 = vld [vmem:[%s3979_s3 + $0x34] ss:$12 sps:$4 sm:$0xff]   ;;  %v2935_v24 = vld [vmem:[%s3979_s3 + $0x38] ss:$12 sps:$4 sm:$0xff]   ;;  %v2939_v28 = vld [vmem:[%s3979_s3 + $0x50] ss:$12 sps:$4 sm:$0xff]  }
  0x26   :  { %2395 = vmatmul.mubr.msk.bf16.gmra.mrb[16].mxu0 %vm226_vm2, %v2903_v7  ;;  %v2910_v25 = vld [vmem:[%s3976_s0 + $0x58] sm:$0xff]   ;;  %v2936_v27 = vld [vmem:[%s3979_s3 + $0x48] ss:$12 sps:$4 sm:$0xff]   ;;  %v2911_v30 = vld [vmem:[%s3976_s0 + $0x60] sm:$0xff]  }
  0x27   :  { %2398 = vmatprep.mubr.msk.bf16.mxu0 %vm2998_vm1, %v2997_v1  ;;  %788 = vmatpush1.bf16.msra.mxu1 %v2928_v16  ;;  %v2912_v31 = vld [vmem:[%s3976_s0 + $0x68] sm:$0xff]   ;;  %v2913_v32 = vld [vmem:[%s3976_s0 + $0x70] sm:$0xff]   ;;  %v2914_v33 = vld [vmem:[%s3976_s0 + $0x78] sm:$0xff]  }
  0x28   :  { %2481 = vmatpush3.bf16.msra.mxu0 %v2931_v17  ;;  %789 = vmatprep.subr.bf16.mxu1 %v2934_v22  ;;  %v2915_v34 = vld [vmem:[%s3976_s0 + $0x80] sm:$0xff]   ;;  %v2916_v35 = vld [vmem:[%s3976_s0 + $0x88] sm:$0xff]   ;;  %v2917_v36 = vld [vmem:[%s3976_s0 + $0x90] sm:$0xff]  }
  0x29   :  { %2475 = vmatmul.mubr.msk.bf16.gmra.mrb[4].mxu1 %vm226_vm2, %v2923_v18  ;;  %2482 = vmatprep.subr.bf16.mxu0 %v2997_v1  ;;  %v2918_v37 = vld [vmem:[%s3976_s0 + $0x98] sm:$0xff]   ;;  %v2919_v38 = vld [vmem:[%s3976_s0 + $0xa0] sm:$0xff]   ;;  %v2920_v39 = vld [vmem:[%s3976_s0 + $0xa8] sm:$0xff]  }
  0x2a   :  { %817 = vmatprep.mubr.bf16.mxu1 %v2999_v29  ;;  %v2921_v40 = vld [vmem:[%s3976_s0 + $0xb0] sm:$0xff]   ;;  %v3276_v41 = vld [vmem:[%s3978_s2] ss:$0 sm:$0xff] }
  0x2b   :  { %790 = vmatpush1.bf16.msra.mxu1 %v2932_v23 }
  0x2c   :  { %2483 = vmatpush3.bf16.msra.mxu0 %v2935_v24  ;;  %791 = vmatprep.subr.bf16.mxu1 %v2938_v26 }
  0x2d   :  { %2484 = vmatprep.subr.bf16.mxu0 %v2997_v1 }
  0x2e   :  { %2399 = vmatmul.mubr.msk.bf16.gmra.mrb[20].mxu0 %vm226_vm2, %v2904_v8 }
  0x2f   :  { %2402 = vmatprep.mubr.msk.bf16.mxu0 %vm2998_vm1, %v2997_v1  ;;  %792 = vmatpush1.bf16.msra.mxu1 %v2936_v27 }
  0x30   :  { %2485 = vmatpush3.bf16.msra.mxu0 %v2939_v28 }
  0x36   :  { %2403 = vmatmul.mubr.msk.bf16.gmra.mrb[24].mxu0 %vm226_vm2, %v2905_v9 }
  0x37   :  { %2406 = vmatprep.mubr.msk.bf16.mxu0 %vm2998_vm1, %v2997_v1 }
  0x3e   :  { %2407 = vmatmul.mubr.msk.bf16.gmra.mrb[28].mxu0 %vm226_vm2, %v2906_v15 }
  0x3f   :  { %2410 = vmatprep.mubr.msk.bf16.mxu0 %vm2998_vm1, %v2997_v1 }
  0x46   :  { %2411 = vmatmul.mubr.msk.bf16.gmra.mrb[32].mxu0 %vm226_vm2, %v2907_v19 }
  0x47   :  { %2414 = vmatprep.mubr.msk.bf16.mxu0 %vm2998_vm1, %v2997_v1 }
  0x4e   :  { %2415 = vmatmul.mubr.msk.bf16.gmra.mrb[36].mxu0 %vm226_vm2, %v2908_v20 }
  0x4f   :  { %2418 = vmatprep.mubr.msk.bf16.mxu0 %vm2998_vm1, %v2997_v1 }
  0x56   :  { %2419 = vmatmul.mubr.msk.bf16.gmra.mrb[40].mxu0 %vm226_vm2, %v2909_v21 }
  0x57   :  { %2422 = vmatprep.mubr.msk.bf16.mxu0 %vm2998_vm1, %v2997_v1 }
  0x5e   :  { %2423 = vmatmul.mubr.msk.bf16.gmra.mrb[44].mxu0 %vm226_vm2, %v2910_v25 }
  0x5f   :  { %2426 = vmatprep.mubr.msk.bf16.mxu0 %vm2998_vm1, %v2997_v1 }
  0x66   :  { %2427 = vmatmul.mubr.msk.bf16.gmra.mrb[48].mxu0 %vm226_vm2, %v2911_v30 }
  0x67   :  { %2430 = vmatprep.mubr.msk.bf16.mxu0 %vm2998_vm1, %v2997_v1 }
  0x6e   :  { %2431 = vmatmul.mubr.msk.bf16.gmra.mrb[52].mxu0 %vm226_vm2, %v2912_v31 }
  0x6f   :  { %2434 = vmatprep.mubr.msk.bf16.mxu0 %vm2998_vm1, %v2997_v1 }
  0x76   :  { %2435 = vmatmul.mubr.msk.bf16.gmra.mrb[56].mxu0 %vm226_vm2, %v2913_v32 }
  0x77   :  { %2438 = vmatprep.mubr.msk.bf16.mxu0 %vm2998_vm1, %v2997_v1 }
  0x7e   :  { %2439 = vmatmul.mubr.msk.bf16.gmra.mrb[60].mxu0 %vm226_vm2, %v2914_v33 }
  0x7f   :  { %2442 = vmatprep.mubr.msk.bf16.mxu0 %vm2998_vm1, %v2997_v1 }
  0x86   :  { %2443 = vmatmul.mubr.msk.bf16.gmra.mrb[64].mxu0 %vm226_vm2, %v2915_v34 }
  0x87   :  { %2446 = vmatprep.mubr.msk.bf16.mxu0 %vm2998_vm1, %v2997_v1 }
  0x8e   :  { %2447 = vmatmul.mubr.msk.bf16.gmra.mrb[68].mxu0 %vm226_vm2, %v2916_v35 }
  0x8f   :  { %2450 = vmatprep.mubr.msk.bf16.mxu0 %vm2998_vm1, %v2997_v1 }
  0x96   :  { %2451 = vmatmul.mubr.msk.bf16.gmra.mrb[72].mxu0 %vm226_vm2, %v2917_v36 }
  0x97   :  { %2454 = vmatprep.mubr.msk.bf16.mxu0 %vm2998_vm1, %v2997_v1 }
  0x9e   :  { %2455 = vmatmul.mubr.msk.bf16.gmra.mrb[76].mxu0 %vm226_vm2, %v2918_v37 }
  0x9f   :  { %2458 = vmatprep.mubr.msk.bf16.mxu0 %vm2998_vm1, %v2997_v1 }
  0xa6   :  { %2459 = vmatmul.mubr.msk.bf16.gmra.mrb[80].mxu0 %vm226_vm2, %v2919_v38 }
  0xa7   :  { %2462 = vmatprep.mubr.msk.bf16.mxu0 %vm2998_vm1, %v2997_v1 }
  0xae   :  { %2463 = vmatmul.mubr.msk.bf16.gmra.mrb[84].mxu0 %vm226_vm2, %v2920_v39 }
  0xaf   :  { %2466 = vmatprep.mubr.msk.bf16.mxu0 %vm2998_vm1, %v2997_v1 }
  0xb6   :  { %2467 = vmatmul.mubr.msk.bf16.gmra.mrb[88].mxu0 %vm226_vm2, %v2921_v40 }
  0xb7   :  { %2486 = vmatprep.mubr.msk.bf16.mxu0 %vm2998_vm1, %v2997_v1 }
  0xd9   :  { %v340_v42 = vpop.f32.mrb[0].mxu0 }
  0xda   :  { %v341_v43 = vadd.f32 %v3276_v41, %v340_v42  ;;  %v2380_v44 = vpop.f32.mrb[1].mxu0 }
  0xdb   :  { %v343_v45 = vpop.f32.mrb[2].mxu0 }
  0xdc   :  { %v344_v46 = vadd.f32 %v3276_v41, %v343_v45  ;;  %v2381_v47 = vpop.f32.mrb[3].mxu0  ;;  %v538_v48 = vmax.f32 %v341_v43, 0.0 }
  0xde   :  { %v539_v49 = vmax.f32 %v344_v46, 0.0 }
  0xe0   :  { %v587_v50 = vpack.c.bf16 %v539_v49, %v538_v48 }
  0xe1   :  { %v348_v51 = vpop.f32.mrb[4].mxu0 }
  0xe2   :  { %v349_v52 = vadd.f32 %v3276_v41, %v348_v51  ;;  %v2384_v53 = vpop.f32.mrb[5].mxu0  ;;  %2162 = vmatmul.mubr.msk.bf16.vlgmr.msra.gmra.mrb[8].mxu1 %vm709_vm3, %v587_v50  ;;  %2487 = vmatmul.mubr.msk.bf16.vlgmr.msra.gmra.mrb[92].mxu0 %vm709_vm3, %v587_v50 }
  0xe3   :  { %v351_v54 = vpop.f32.mrb[6].mxu0  ;;  %827 = vmatprep.mubr.bf16.mxu1 %v2999_v29  ;;  %2490 = vmatprep.mubr.msk.bf16.mxu0 %vm2998_vm1, %v2997_v1 }
  0xe4   :  { %v352_v55 = vadd.f32 %v3276_v41, %v351_v54  ;;  %v2385_v56 = vpop.f32.mrb[7].mxu0  ;;  %v540_v57 = vmax.f32 %v349_v52, 0.0 }
  0xe6   :  { %v541_v58 = vmax.f32 %v352_v55, 0.0 }
  0xe8   :  { %v588_v59 = vpack.c.bf16 %v541_v58, %v540_v57 }
  0xe9   :  { %v356_v60 = vpop.f32.mrb[8].mxu0 }
  0xea   :  { %v357_v61 = vadd.f32 %v3276_v41, %v356_v60  ;;  %v2388_v62 = vpop.f32.mrb[9].mxu0  ;;  %2163 = vmatmul.mubr.msk.bf16.gmra.mrb[12].mxu1 %vm709_vm3, %v588_v59  ;;  %2491 = vmatmul.mubr.msk.bf16.gmra.mrb[96].mxu0 %vm709_vm3, %v588_v59 }
  0xeb   :  { %v359_v63 = vpop.f32.mrb[10].mxu0  ;;  %837 = vmatprep.mubr.bf16.mxu1 %v2999_v29  ;;  %2494 = vmatprep.mubr.msk.bf16.mxu0 %vm2998_vm1, %v2997_v1 }
  0xec   :  { %v360_v0 = vadd.f32 %v3276_v41, %v359_v63  ;;  %v2389_v2 = vpop.f32.mrb[11].mxu0  ;;  %v542_v3 = vmax.f32 %v357_v61, 0.0 }
  0xee   :  { %v543_v4 = vmax.f32 %v360_v0, 0.0 }
  0xf0   :  { %v589_v5 = vpack.c.bf16 %v543_v4, %v542_v3 }
  0xf1   :  { %v364_v6 = vpop.f32.mrb[12].mxu0 }
  0xf2   :  { %v365_v7 = vadd.f32 %v3276_v41, %v364_v6  ;;  %v2392_v8 = vpop.f32.mrb[13].mxu0  ;;  %2164 = vmatmul.mubr.msk.bf16.gmra.mrb[16].mxu1 %vm709_vm3, %v589_v5  ;;  %2495 = vmatmul.mubr.msk.bf16.gmra.mrb[100].mxu0 %vm709_vm3, %v589_v5 }
  0xf3   :  { %v367_v9 = vpop.f32.mrb[14].mxu0  ;;  %847 = vmatprep.mubr.bf16.mxu1 %v2999_v29  ;;  %2498 = vmatprep.mubr.msk.bf16.mxu0 %vm2998_vm1, %v2997_v1 }
  0xf4   :  { %v368_v10 = vadd.f32 %v3276_v41, %v367_v9  ;;  %v2393_v11 = vpop.f32.mrb[15].mxu0  ;;  %v544_v12 = vmax.f32 %v365_v7, 0.0  ;;  %v524_v43 = vpop.f32.mrb[0].mxu1 }
  0xf5   :  { %v2472_v44 = vpop.f32.mrb[1].mxu1  ;;  %v525_v46 = vadd.f32 %v3276_v41, %v524_v43 }
  0xf6   :  { %v545_v13 = vmax.f32 %v368_v10, 0.0  ;;  %v527_v47 = vpop.f32.mrb[2].mxu1 }
  0xf7   :  { %v2473_v49 = vpop.f32.mrb[3].mxu1  ;;  %v584_v52 = vmax.f32 %v525_v46, 0.0  ;;  %v528_v53 = vadd.f32 %v3276_v41, %v527_v47 }
  0xf8   :  { %v590_v14 = vpack.c.bf16 %v545_v13, %v544_v12 }
  0xf9   :  { %v372_v15 = vpop.f32.mrb[16].mxu0  ;;  %v585_v57 = vmax.f32 %v528_v53, 0.0 }
  0xfa   :  { %v373_v16 = vadd.f32 %v3276_v41, %v372_v15  ;;  %v2396_v17 = vpop.f32.mrb[17].mxu0  ;;  %2165 = vmatmul.mubr.msk.bf16.gmra.mrb[20].mxu1 %vm709_vm3, %v590_v14  ;;  %2499 = vmatmul.mubr.msk.bf16.gmra.mrb[104].mxu0 %vm709_vm3, %v590_v14 }
  0xfb   :  { %v375_v18 = vpop.f32.mrb[18].mxu0  ;;  %857 = vmatprep.mubr.bf16.mxu1 %v2999_v29  ;;  %2502 = vmatprep.mubr.msk.bf16.mxu0 %vm2998_vm1, %v2997_v1  ;;  %v3331_v60 = vpack.c.bf16 %v585_v57, %v584_v52 }
  0xfc   :  { %v376_v19 = vadd.f32 %v3276_v41, %v375_v18  ;;  %v2397_v20 = vpop.f32.mrb[19].mxu0  ;;  %v546_v21 = vmax.f32 %v373_v16, 0.0  ;;  %v3333_v62 = vpop.f32.mrb[4].mxu1 }
  0xfd   :  { %v2476_v0 = vpop.f32.mrb[5].mxu1 }
  0xfe   :  { %v547_v22 = vmax.f32 %v376_v19, 0.0  ;;  %v535_v4 = vpop.f32.mrb[6].mxu1 }
  0xff   :  { %v2477_v6 = vpop.f32.mrb[7].mxu1 }
 0x100   :  { %v591_v23 = vpack.c.bf16 %v547_v22, %v546_v21 }
 0x101   :  { %v380_v24 = vpop.f32.mrb[20].mxu0 }
 0x102   :  { %v381_v25 = vadd.f32 %v3276_v41, %v380_v24  ;;  %v2400_v26 = vpop.f32.mrb[21].mxu0  ;;  %2166 = vmatmul.mubr.msk.bf16.gmra.mrb[24].mxu1 %vm709_vm3, %v591_v23  ;;  %2503 = vmatmul.mubr.msk.bf16.gmra.mrb[108].mxu0 %vm709_vm3, %v591_v23 }
 0x103   :  { %v383_v27 = vpop.f32.mrb[22].mxu0  ;;  %867 = vmatprep.mubr.bf16.mxu1 %v2999_v29  ;;  %2506 = vmatprep.mubr.msk.bf16.mxu0 %vm2998_vm1, %v2997_v1 }
 0x104   :  { %v384_v28 = vadd.f32 %v3276_v41, %v383_v27  ;;  %v2401_v30 = vpop.f32.mrb[23].mxu0  ;;  %v548_v31 = vmax.f32 %v381_v25, 0.0 }
 0x106   :  { %v549_v32 = vmax.f32 %v384_v28, 0.0 }
 0x108   :  { %v592_v33 = vpack.c.bf16 %v549_v32, %v548_v31 }
 0x109   :  { %v388_v34 = vpop.f32.mrb[24].mxu0 }
 0x10a   :  { %v389_v35 = vadd.f32 %v3276_v41, %v388_v34  ;;  %v2404_v36 = vpop.f32.mrb[25].mxu0  ;;  %2167 = vmatmul.mubr.msk.bf16.gmra.mrb[28].mxu1 %vm709_vm3, %v592_v33  ;;  %2507 = vmatmul.mubr.msk.bf16.gmra.mrb[112].mxu0 %vm709_vm3, %v592_v33 }
 0x10b   :  { %v391_v37 = vpop.f32.mrb[26].mxu0  ;;  %877 = vmatprep.mubr.bf16.mxu1 %v2999_v29  ;;  %2510 = vmatprep.mubr.msk.bf16.mxu0 %vm2998_vm1, %v2997_v1 }
 0x10c   :  { %v392_v38 = vadd.f32 %v3276_v41, %v391_v37  ;;  %v2405_v39 = vpop.f32.mrb[27].mxu0  ;;  %v550_v40 = vmax.f32 %v389_v35, 0.0 }
 0x10e   :  { %v551_v42 = vmax.f32 %v392_v38, 0.0 }
 0x110   :  { %v593_v45 = vpack.c.bf16 %v551_v42, %v550_v40 }
 0x111   :  { %v396_v48 = vpop.f32.mrb[28].mxu0 }
 0x112   :  { %v397_v50 = vadd.f32 %v3276_v41, %v396_v48  ;;  %v2408_v51 = vpop.f32.mrb[29].mxu0  ;;  %2168 = vmatmul.mubr.msk.bf16.gmra.mrb[32].mxu1 %vm709_vm3, %v593_v45  ;;  %2511 = vmatmul.mubr.msk.bf16.gmra.mrb[116].mxu0 %vm709_vm3, %v593_v45 }
 0x113   :  { %v399_v54 = vpop.f32.mrb[30].mxu0  ;;  %887 = vmatprep.mubr.bf16.mxu1 %v2999_v29  ;;  %2514 = vmatprep.mubr.msk.bf16.mxu0 %vm2998_vm1, %v2997_v1 }
 0x114   :  { %v400_v55 = vadd.f32 %v3276_v41, %v399_v54  ;;  %v2409_v56 = vpop.f32.mrb[31].mxu0  ;;  %v552_v58 = vmax.f32 %v397_v50, 0.0 }
 0x116   :  { %v553_v59 = vmax.f32 %v400_v55, 0.0 }
 0x118   :  { %v594_v61 = vpack.c.bf16 %v553_v59, %v552_v58 }
 0x119   :  { %v404_v63 = vpop.f32.mrb[32].mxu0 }
 0x11a   :  { %v405_v2 = vadd.f32 %v3276_v41, %v404_v63  ;;  %v2412_v3 = vpop.f32.mrb[33].mxu0  ;;  %2169 = vmatmul.mubr.msk.bf16.gmra.mrb[36].mxu1 %vm709_vm3, %v594_v61  ;;  %2515 = vmatmul.mubr.msk.bf16.gmra.mrb[120].mxu0 %vm709_vm3, %v594_v61 }
 0x11b   :  { %v407_v5 = vpop.f32.mrb[34].mxu0  ;;  %897 = vmatprep.mubr.bf16.mxu1 %v2999_v29  ;;  %2518 = vmatprep.mubr.msk.bf16.mxu0 %vm2998_vm1, %v2997_v1 }
 0x11c   :  { %v408_v7 = vadd.f32 %v3276_v41, %v407_v5  ;;  %v2413_v8 = vpop.f32.mrb[35].mxu0  ;;  %v554_v9 = vmax.f32 %v405_v2, 0.0 }
 0x11e   :  { %v555_v10 = vmax.f32 %v408_v7, 0.0 }
 0x120   :  { %v595_v11 = vpack.c.bf16 %v555_v10, %v554_v9 }
 0x121   :  { %v412_v12 = vpop.f32.mrb[36].mxu0 }
 0x122   :  { %v413_v13 = vadd.f32 %v3276_v41, %v412_v12  ;;  %v2416_v14 = vpop.f32.mrb[37].mxu0  ;;  %2170 = vmatmul.mubr.msk.bf16.gmra.mrb[40].mxu1 %vm709_vm3, %v595_v11  ;;  %2519 = vmatmul.mubr.msk.bf16.gmra.mrb[124].mxu0 %vm709_vm3, %v595_v11 }
 0x123   :  { %v415_v15 = vpop.f32.mrb[38].mxu0  ;;  %907 = vmatprep.mubr.bf16.mxu1 %v2999_v29  ;;  %2522 = vmatprep.mubr.msk.bf16.mxu0 %vm2998_vm1, %v2997_v1 }
 0x124   :  { %v416_v16 = vadd.f32 %v3276_v41, %v415_v15  ;;  %v2417_v17 = vpop.f32.mrb[39].mxu0  ;;  %v556_v18 = vmax.f32 %v413_v13, 0.0 }
 0x126   :  { %v557_v19 = vmax.f32 %v416_v16, 0.0 }
 0x128   :  { %v596_v20 = vpack.c.bf16 %v557_v19, %v556_v18 }
 0x129   :  { %v420_v21 = vpop.f32.mrb[40].mxu0 }
 0x12a   :  { %v421_v22 = vadd.f32 %v3276_v41, %v420_v21  ;;  %v2420_v23 = vpop.f32.mrb[41].mxu0  ;;  %2171 = vmatmul.mubr.msk.bf16.gmra.mrb[44].mxu1 %vm709_vm3, %v596_v20  ;;  %2523 = vmatmul.mubr.msk.bf16.gmra.mrb[128].mxu0 %vm709_vm3, %v596_v20 }
 0x12b   :  { %v423_v24 = vpop.f32.mrb[42].mxu0  ;;  %917 = vmatprep.mubr.bf16.mxu1 %v2999_v29  ;;  %2526 = vmatprep.mubr.msk.bf16.mxu0 %vm2998_vm1, %v2997_v1 }
 0x12c   :  { %v424_v25 = vadd.f32 %v3276_v41, %v423_v24  ;;  %v2421_v26 = vpop.f32.mrb[43].mxu0  ;;  %v558_v27 = vmax.f32 %v421_v22, 0.0 }
 0x12e   :  { %v559_v28 = vmax.f32 %v424_v25, 0.0 }
 0x130   :  { %v597_v30 = vpack.c.bf16 %v559_v28, %v558_v27 }
 0x131   :  { %v428_v31 = vpop.f32.mrb[44].mxu0 }
 0x132   :  { %v429_v32 = vadd.f32 %v3276_v41, %v428_v31  ;;  %v2424_v33 = vpop.f32.mrb[45].mxu0  ;;  %2172 = vmatmul.mubr.msk.bf16.gmra.mrb[48].mxu1 %vm709_vm3, %v597_v30  ;;  %2527 = vmatmul.mubr.msk.bf16.gmra.mrb[132].mxu0 %vm709_vm3, %v597_v30 }
 0x133   :  { %v431_v34 = vpop.f32.mrb[46].mxu0  ;;  %927 = vmatprep.mubr.bf16.mxu1 %v2999_v29  ;;  %2530 = vmatprep.mubr.msk.bf16.mxu0 %vm2998_vm1, %v2997_v1 }
 0x134   :  { %v432_v35 = vadd.f32 %v3276_v41, %v431_v34  ;;  %v2425_v36 = vpop.f32.mrb[47].mxu0  ;;  %v560_v37 = vmax.f32 %v429_v32, 0.0 }
 0x136   :  { %v561_v38 = vmax.f32 %v432_v35, 0.0 }
 0x138   :  { %v598_v39 = vpack.c.bf16 %v561_v38, %v560_v37 }
 0x139   :  { %v436_v40 = vpop.f32.mrb[48].mxu0 }
 0x13a   :  { %v437_v42 = vadd.f32 %v3276_v41, %v436_v40  ;;  %v2428_v43 = vpop.f32.mrb[49].mxu0  ;;  %2173 = vmatmul.mubr.msk.bf16.gmra.mrb[52].mxu1 %vm709_vm3, %v598_v39  ;;  %2531 = vmatmul.mubr.msk.bf16.gmra.mrb[136].mxu0 %vm709_vm3, %v598_v39 }
 0x13b   :  { %v439_v44 = vpop.f32.mrb[50].mxu0  ;;  %937 = vmatprep.mubr.bf16.mxu1 %v2999_v29  ;;  %2534 = vmatprep.mubr.msk.bf16.mxu0 %vm2998_vm1, %v2997_v1 }
 0x13c   :  { %v440_v45 = vadd.f32 %v3276_v41, %v439_v44  ;;  %v2429_v46 = vpop.f32.mrb[51].mxu0  ;;  %v562_v47 = vmax.f32 %v437_v42, 0.0 }
 0x13e   :  { %v563_v48 = vmax.f32 %v440_v45, 0.0 }
 0x140   :  { %v599_v49 = vpack.c.bf16 %v563_v48, %v562_v47 }
 0x141   :  { %v444_v50 = vpop.f32.mrb[52].mxu0 }
 0x142   :  { %v445_v51 = vadd.f32 %v3276_v41, %v444_v50  ;;  %v2432_v52 = vpop.f32.mrb[53].mxu0  ;;  %2174 = vmatmul.mubr.msk.bf16.gmra.mrb[56].mxu1 %vm709_vm3, %v599_v49  ;;  %2535 = vmatmul.mubr.msk.bf16.gmra.mrb[140].mxu0 %vm709_vm3, %v599_v49 }
 0x143   :  { %v447_v53 = vpop.f32.mrb[54].mxu0  ;;  %947 = vmatprep.mubr.bf16.mxu1 %v2999_v29  ;;  %2538 = vmatprep.mubr.msk.bf16.mxu0 %vm2998_vm1, %v2997_v1 }
 0x144   :  { %v448_v54 = vadd.f32 %v3276_v41, %v447_v53  ;;  %v2433_v55 = vpop.f32.mrb[55].mxu0  ;;  %v564_v56 = vmax.f32 %v445_v51, 0.0 }
 0x146   :  { %v565_v57 = vmax.f32 %v448_v54, 0.0 }
 0x148   :  { %v600_v58 = vpack.c.bf16 %v565_v57, %v564_v56 }
 0x149   :  { %v452_v59 = vpop.f32.mrb[56].mxu0 }
 0x14a   :  { %v453_v61 = vadd.f32 %v3276_v41, %v452_v59  ;;  %v2436_v63 = vpop.f32.mrb[57].mxu0  ;;  %2175 = vmatmul.mubr.msk.bf16.gmra.mrb[60].mxu1 %vm709_vm3, %v600_v58  ;;  %2539 = vmatmul.mubr.msk.bf16.gmra.mrb[144].mxu0 %vm709_vm3, %v600_v58 }
 0x14b   :  { %v455_v0 = vpop.f32.mrb[58].mxu0  ;;  %957 = vmatprep.mubr.bf16.mxu1 %v2999_v29  ;;  %2542 = vmatprep.mubr.msk.bf16.mxu0 %vm2998_vm1, %v2997_v1 }
 0x14c   :  { %v456_v2 = vadd.f32 %v3276_v41, %v455_v0  ;;  %v2437_v3 = vpop.f32.mrb[59].mxu0  ;;  %v566_v4 = vmax.f32 %v453_v61, 0.0 }
 0x14e   :  { %v567_v5 = vmax.f32 %v456_v2, 0.0 }
 0x150   :  { %v601_v6 = vpack.c.bf16 %v567_v5, %v566_v4 }
 0x151   :  { %v460_v7 = vpop.f32.mrb[60].mxu0 }
 0x152   :  { %v461_v8 = vadd.f32 %v3276_v41, %v460_v7  ;;  %v2440_v9 = vpop.f32.mrb[61].mxu0  ;;  %2176 = vmatmul.mubr.msk.bf16.gmra.mrb[64].mxu1 %vm709_vm3, %v601_v6  ;;  %2543 = vmatmul.mubr.msk.bf16.gmra.mrb[148].mxu0 %vm709_vm3, %v601_v6 }
 0x153   :  { %v463_v10 = vpop.f32.mrb[62].mxu0  ;;  %967 = vmatprep.mubr.bf16.mxu1 %v2999_v29  ;;  %2546 = vmatprep.mubr.msk.bf16.mxu0 %vm2998_vm1, %v2997_v1 }
 0x154   :  { %v464_v11 = vadd.f32 %v3276_v41, %v463_v10  ;;  %v2441_v12 = vpop.f32.mrb[63].mxu0  ;;  %v568_v13 = vmax.f32 %v461_v8, 0.0 }
 0x156   :  { %v569_v14 = vmax.f32 %v464_v11, 0.0 }
 0x158   :  { %v602_v15 = vpack.c.bf16 %v569_v14, %v568_v13 }
 0x159   :  { %v468_v16 = vpop.f32.mrb[64].mxu0 }
 0x15a   :  { %v469_v17 = vadd.f32 %v3276_v41, %v468_v16  ;;  %v2444_v18 = vpop.f32.mrb[65].mxu0  ;;  %2177 = vmatmul.mubr.msk.bf16.gmra.mrb[68].mxu1 %vm709_vm3, %v602_v15  ;;  %2547 = vmatmul.mubr.msk.bf16.gmra.mrb[152].mxu0 %vm709_vm3, %v602_v15 }
 0x15b   :  { %v471_v19 = vpop.f32.mrb[66].mxu0  ;;  %977 = vmatprep.mubr.bf16.mxu1 %v2999_v29  ;;  %2550 = vmatprep.mubr.msk.bf16.mxu0 %vm2998_vm1, %v2997_v1 }
 0x15c   :  { %v472_v20 = vadd.f32 %v3276_v41, %v471_v19  ;;  %v2445_v21 = vpop.f32.mrb[67].mxu0  ;;  %v570_v22 = vmax.f32 %v469_v17, 0.0 }
 0x15e   :  { %v571_v23 = vmax.f32 %v472_v20, 0.0  ;;  %v533_v20 = vadd.f32 %v3276_v41, %v3333_v62 }
 0x160   :  { %v603_v24 = vpack.c.bf16 %v571_v23, %v570_v22  ;;  %v586_v21 = vmax.f32 %v533_v20, 0.0  ;;  %v630_v23 = vlaneseq }
 0x161   :  { %v476_v25 = vpop.f32.mrb[68].mxu0 }
 0x162   :  { %v477_v26 = vadd.f32 %v3276_v41, %v476_v25  ;;  %v2448_v27 = vpop.f32.mrb[69].mxu0  ;;  %2178 = vmatmul.mubr.msk.bf16.gmra.mrb[72].mxu1 %vm709_vm3, %v603_v24  ;;  %2551 = vmatmul.mubr.msk.bf16.gmra.mrb[156].mxu0 %vm709_vm3, %v603_v24  ;;  %v611_v22 = vpack.c.bf16 %v586_v21, %v586_v21  ;;  %v628_v25 = vld [vmem:[%s3980_s4] sm:$0x7] }
 0x163   :  { %v479_v28 = vpop.f32.mrb[70].mxu0  ;;  %987 = vmatprep.mubr.bf16.mxu1 %v2999_v29  ;;  %2554 = vmatprep.mubr.msk.bf16.mxu0 %vm2998_vm1, %v2997_v1 }
 0x164   :  { %v480_v30 = vadd.f32 %v3276_v41, %v479_v28  ;;  %v2449_v31 = vpop.f32.mrb[71].mxu0  ;;  %v572_v32 = vmax.f32 %v477_v26, 0.0 }
 0x165   :  { %v3000_v31 = vmov 1983009808  }
 0x166   :  { %v573_v33 = vmax.f32 %v480_v30, 0.0 }
 0x168   :  { %v604_v34 = vpack.c.bf16 %v573_v33, %v572_v32  ;;  %v1449_v32 = vunpack.c.l.s4 %v3000_v31 }
 0x169   :  { %v484_v35 = vpop.f32.mrb[72].mxu0 }
 0x16a   :  { %v485_v36 = vadd.f32 %v3276_v41, %v484_v35  ;;  %v2452_v37 = vpop.f32.mrb[73].mxu0  ;;  %2179 = vmatmul.mubr.msk.bf16.gmra.mrb[76].mxu1 %vm709_vm3, %v604_v34  ;;  %2555 = vmatmul.mubr.msk.bf16.gmra.mrb[160].mxu0 %vm709_vm3, %v604_v34 }
 0x16b   :  { %v487_v38 = vpop.f32.mrb[74].mxu0  ;;  %997 = vmatprep.mubr.bf16.mxu1 %v2999_v29  ;;  %2558 = vmatprep.mubr.msk.bf16.mxu0 %vm2998_vm1, %v2997_v1 }
 0x16c   :  { %v488_v39 = vadd.f32 %v3276_v41, %v487_v38  ;;  %v2453_v40 = vpop.f32.mrb[75].mxu0  ;;  %v574_v42 = vmax.f32 %v485_v36, 0.0 }
 0x16d   :  { %v1450_v40 = vunpack.c.0.s8 %v1449_v32 }
 0x16e   :  { %v575_v43 = vmax.f32 %v488_v39, 0.0 }
 0x170   :  { %v605_v44 = vpack.c.bf16 %v575_v43, %v574_v42 }
 0x171   :  { %v492_v45 = vpop.f32.mrb[76].mxu0 }
 0x172   :  { %v493_v46 = vadd.f32 %v3276_v41, %v492_v45  ;;  %v2456_v47 = vpop.f32.mrb[77].mxu0  ;;  %2180 = vmatmul.mubr.msk.bf16.gmra.mrb[80].mxu1 %vm709_vm3, %v605_v44  ;;  %2559 = vmatmul.mubr.msk.bf16.gmra.mrb[164].mxu0 %vm709_vm3, %v605_v44 }
 0x173   :  { %v495_v48 = vpop.f32.mrb[78].mxu0  ;;  %1007 = vmatprep.mubr.bf16.mxu1 %v2999_v29  ;;  %2562 = vmatprep.mubr.msk.bf16.mxu0 %vm2998_vm1, %v2997_v1 }
 0x174   :  { %v496_v49 = vadd.f32 %v3276_v41, %v495_v48  ;;  %v2457_v50 = vpop.f32.mrb[79].mxu0  ;;  %v576_v51 = vmax.f32 %v493_v46, 0.0 }
 0x176   :  { %v577_v52 = vmax.f32 %v496_v49, 0.0 }
 0x178   :  { %v606_v53 = vpack.c.bf16 %v577_v52, %v576_v51  ;;  %v3477_v52 = vld [vmem:[%s3981_s5] sm:$0xff] }
 0x179   :  { %v500_v54 = vpop.f32.mrb[80].mxu0 }
 0x17a   :  { %v501_v55 = vadd.f32 %v3276_v41, %v500_v54  ;;  %v2460_v56 = vpop.f32.mrb[81].mxu0  ;;  %2181 = vmatmul.mubr.msk.bf16.gmra.mrb[84].mxu1 %vm709_vm3, %v606_v53  ;;  %2563 = vmatmul.mubr.msk.bf16.gmra.mrb[168].mxu0 %vm709_vm3, %v606_v53 }
 0x17b   :  { %v503_v57 = vpop.f32.mrb[82].mxu0  ;;  %1017 = vmatprep.mubr.bf16.mxu1 %v2999_v29  ;;  %2566 = vmatprep.mubr.msk.bf16.mxu0 %vm2998_vm1, %v2997_v1 }
 0x17c   :  { %v504_v58 = vadd.f32 %v3276_v41, %v503_v57  ;;  %v2461_v59 = vpop.f32.mrb[83].mxu0  ;;  %v578_v61 = vmax.f32 %v501_v55, 0.0 }
 0x17e   :  { %v579_v63 = vmax.f32 %v504_v58, 0.0 }
 0x180   :  { %v607_v0 = vpack.c.bf16 %v579_v63, %v578_v61 }
 0x181   :  { %v508_v2 = vpop.f32.mrb[84].mxu0 }
 0x182   :  { %v509_v3 = vadd.f32 %v3276_v41, %v508_v2  ;;  %v2464_v4 = vpop.f32.mrb[85].mxu0  ;;  %2182 = vmatmul.mubr.msk.bf16.gmra.mrb[88].mxu1 %vm709_vm3, %v607_v0  ;;  %2567 = vmatmul.mubr.msk.bf16.gmra.mrb[172].mxu0 %vm709_vm3, %v607_v0 }
 0x183   :  { %v511_v5 = vpop.f32.mrb[86].mxu0  ;;  %1027 = vmatprep.mubr.bf16.mxu1 %v2999_v29  ;;  %2570 = vmatprep.mubr.msk.bf16.mxu0 %vm2998_vm1, %v2997_v1 }
 0x184   :  { %v512_v6 = vadd.f32 %v3276_v41, %v511_v5  ;;  %v2465_v7 = vpop.f32.mrb[87].mxu0  ;;  %v580_v8 = vmax.f32 %v509_v3, 0.0 }
 0x186   :  { %v581_v9 = vmax.f32 %v512_v6, 0.0 }
 0x188   :  { %v608_v10 = vpack.c.bf16 %v581_v9, %v580_v8 }
 0x189   :  { %v516_v11 = vpop.f32.mrb[88].mxu0 }
 0x18a   :  { %v517_v12 = vadd.f32 %v3276_v41, %v516_v11  ;;  %v2468_v13 = vpop.f32.mrb[89].mxu0  ;;  %2183 = vmatmul.mubr.msk.bf16.gmra.mrb[92].mxu1 %vm709_vm3, %v608_v10  ;;  %2571 = vmatmul.mubr.msk.bf16.gmra.mrb[176].mxu0 %vm709_vm3, %v608_v10 }
 0x18b   :  { %v519_v14 = vpop.f32.mrb[90].mxu0  ;;  %1037 = vmatprep.mubr.bf16.mxu1 %v2999_v29  ;;  %2574 = vmatprep.mubr.msk.bf16.mxu0 %vm2998_vm1, %v2997_v1 }
 0x18c   :  { %v520_v15 = vadd.f32 %v3276_v41, %v519_v14  ;;  %v2469_v16 = vpop.f32.mrb[91].mxu0  ;;  %v582_v17 = vmax.f32 %v517_v12, 0.0  ;;  %v631_v41 = vshrl.u32 %v630_v23, 7 }
 0x18e   :  { %v583_v18 = vmax.f32 %v520_v15, 0.0  ;;  %v632_v62 = vsub.s32 0, %v631_v41  ;;  %v640_v24 = vsub.s32 2, %v631_v41  ;;  %v3472_v47 = vsub.s32 %v1450_v40, %v631_v41 }
 0x190   :  { %v609_v19 = vpack.c.bf16 %v583_v18, %v582_v17  ;;  %v3460_v26 = vrot.slane %v628_v25, %v632_v62  ;;  %v3481_v55 = vrot.slane %v3477_v52, %v3472_v47 }
 0x192   :  { %2184 = vmatmul.mubr.msk.bf16.gmra.mrb[96].mxu1 %vm709_vm3, %v609_v19  ;;  %2575 = vmatmul.mubr.msk.bf16.gmra.mrb[180].mxu0 %vm709_vm3, %v609_v19  ;;  %v3487_v63 = vcombine.high %v3481_v55, %v3481_v55 }
 0x193   :  { %1047 = vmatprep.mubr.bf16.mxu1 %v2999_v29  ;;  %2578 = vmatprep.mubr.msk.bf16.mxu0 %vm2998_vm1, %v2997_v1 }
 0x19a   :  { %2185 = vmatmul.mubr.msk.bf16.gmra.mrb[100].mxu1 %vm709_vm3, %v3331_v60  ;;  %2579 = vmatmul.mubr.msk.bf16.gmra.mrb[184].mxu0 %vm709_vm3, %v3331_v60  ;;  %v636_v60 = vsub.s32 1, %v631_v41 }
 0x19b   :  { %1057 = vmatprep.mubr.bf16.mxu1 %v2999_v29  ;;  %2582 = vmatprep.mubr.msk.bf16.mxu0 %vm2998_vm1, %v2997_v1  ;;  %v3462_v29 = vrot.slane %v628_v25, %v640_v24 }
 0x19c   :  { %v3464_v27 = vrot.slane %v628_v25, %v636_v60 }
 0x1a2   :  { %2186 = vmatmul.mubr.msk.bf16.gmra.mrb[104].mxu1 %vm709_vm3, %v611_v22  ;;  %2583 = vmatmul.mubr.msk.bf16.gmra.mrb[188].mxu0 %vm709_vm3, %v611_v22 }
 0x1a3   :  { %1534 = vmatprep.mubr.f32.mxu1 %v3487_v63 }
 0x1b5   :  { %v819_v28 = vpop.f32.mrb[8].mxu1  ;;  %v1100_v30 = vpop.f32.mrb[92].mxu0 }
 0x1b6   :  { %v820_v33 = vadd.f32 %v819_v28, %v3460_v26  ;;  %v1101_v34 = vadd.f32 %v1100_v30, %v3462_v29  ;;  %v821_v35 = vpop.f32.mrb[9].mxu1  ;;  %v2488_v36 = vpop.f32.mrb[93].mxu0 }
 0x1b7   :  { %v822_v37 = vadd.f32 %v821_v35, %v3464_v27  ;;  %v823_v38 = vpop.f32.mrb[10].mxu1  ;;  %v1103_v39 = vpop.f32.mrb[94].mxu0 }
 0x1b8   :  { %v824_v42 = vadd.f32 %v823_v38, %v3460_v26  ;;  %v1104_v43 = vadd.f32 %v1103_v39, %v3462_v29  ;;  %v825_v44 = vpop.f32.mrb[11].mxu1  ;;  %v2489_v45 = vpop.f32.mrb[95].mxu0  ;;  %v1298_v48 = vmax.f32 %v820_v33, 0.0  ;;  %v1300_v49 = vmax.f32 %v1101_v34, 0.0 }
 0x1b9   :  { %v826_v46 = vadd.f32 %v825_v44, %v3464_v27  ;;  %v1299_v53 = vmax.f32 %v822_v37, 0.0 }
 0x1ba   :  { %v1301_v50 = vmax.f32 %v824_v42, 0.0  ;;  %v1303_v51 = vmax.f32 %v1104_v43, 0.0 }
 0x1bb   :  { %v1302_v54 = vmax.f32 %v826_v46, 0.0 }
 0x1bc   :  { %v2658_v56 = vpack.c.bf16 %v1301_v50, %v1298_v48  ;;  %v3483_v57 = vpack.c.bf16 %v1303_v51, %v1300_v49 }
 0x1bd   :  { %v2656_v58 = vpack.c.bf16 %v1302_v54, %v1299_v53  ;;  %v829_v59 = vpop.f32.mrb[12].mxu1  ;;  %v1108_v61 = vpop.f32.mrb[96].mxu0 }
 0x1be   :  { %v830_v0 = vadd.f32 %v829_v59, %v3460_v26  ;;  %v1109_v2 = vadd.f32 %v1108_v61, %v3462_v29  ;;  %v831_v3 = vpop.f32.mrb[13].mxu1  ;;  %v2492_v4 = vpop.f32.mrb[97].mxu0 }
 0x1bf   :  { %v832_v5 = vadd.f32 %v831_v3, %v3464_v27  ;;  %v833_v6 = vpop.f32.mrb[14].mxu1  ;;  %v1111_v7 = vpop.f32.mrb[98].mxu0  ;;  %2657 = vmatprep.subr.bf16.mxu1 %v2656_v58 }
 0x1c0   :  { %v834_v8 = vadd.f32 %v833_v6, %v3460_v26  ;;  %v1112_v9 = vadd.f32 %v1111_v7, %v3462_v29  ;;  %v835_v10 = vpop.f32.mrb[15].mxu1  ;;  %v2493_v11 = vpop.f32.mrb[99].mxu0  ;;  %2659 = vmatpush1.bf16.msra.mxu1 %v2658_v56  ;;  %v1304_v13 = vmax.f32 %v830_v0, 0.0  ;;  %v1306_v14 = vmax.f32 %v1109_v2, 0.0 }
 0x1c1   :  { %v836_v12 = vadd.f32 %v835_v10, %v3464_v27  ;;  %v1305_v17 = vmax.f32 %v832_v5, 0.0 }
 0x1c2   :  { %v1307_v15 = vmax.f32 %v834_v8, 0.0  ;;  %v1309_v16 = vmax.f32 %v1112_v9, 0.0 }
 0x1c3   :  { %v1308_v18 = vmax.f32 %v836_v12, 0.0 }
 0x1c4   :  { %v2662_v19 = vpack.c.bf16 %v1307_v15, %v1304_v13  ;;  %v3496_v20 = vpack.c.bf16 %v1309_v16, %v1306_v14 }
 0x1c5   :  { %v2660_v21 = vpack.c.bf16 %v1308_v18, %v1305_v17  ;;  %v839_v22 = vpop.f32.mrb[16].mxu1  ;;  %v1116_v41 = vpop.f32.mrb[100].mxu0 }
 0x1c6   :  { %v840_v62 = vadd.f32 %v839_v22, %v3460_v26  ;;  %v841_v24 = vpop.f32.mrb[17].mxu1  ;;  %v1117_v25 = vadd.f32 %v1116_v41, %v3462_v29  ;;  %v2496_v60 = vpop.f32.mrb[101].mxu0 }
 0x1c7   :  { %2661 = vmatprep.subr.bf16.mxu1 %v2660_v21  ;;  %v842_v28 = vadd.f32 %v841_v24, %v3464_v27  ;;  %v843_v30 = vpop.f32.mrb[18].mxu1  ;;  %v1119_v31 = vpop.f32.mrb[102].mxu0 }
 0x1c8   :  { %2663 = vmatpush1.bf16.msra.mxu1 %v2662_v19  ;;  %v844_v32 = vadd.f32 %v843_v30, %v3460_v26  ;;  %v845_v33 = vpop.f32.mrb[19].mxu1  ;;  %v1120_v34 = vadd.f32 %v1119_v31, %v3462_v29  ;;  %v2497_v35 = vpop.f32.mrb[103].mxu0  ;;  %v1310_v37 = vmax.f32 %v840_v62, 0.0  ;;  %v1312_v38 = vmax.f32 %v1117_v25, 0.0 }
 0x1c9   :  { %v846_v36 = vadd.f32 %v845_v33, %v3464_v27  ;;  %v1311_v42 = vmax.f32 %v842_v28, 0.0 }
 0x1ca   :  { %v1313_v39 = vmax.f32 %v844_v32, 0.0  ;;  %v1315_v40 = vmax.f32 %v1120_v34, 0.0 }
 0x1cb   :  { %v1314_v43 = vmax.f32 %v846_v36, 0.0 }
 0x1cc   :  { %v2666_v44 = vpack.c.bf16 %v1313_v39, %v1310_v37  ;;  %v3504_v45 = vpack.c.bf16 %v1315_v40, %v1312_v38 }
 0x1cd   :  { %v2664_v46 = vpack.c.bf16 %v1314_v43, %v1311_v42  ;;  %v849_v48 = vpop.f32.mrb[20].mxu1  ;;  %v1124_v49 = vpop.f32.mrb[104].mxu0 }
 0x1ce   :  { %v850_v50 = vadd.f32 %v849_v48, %v3460_v26  ;;  %v851_v51 = vpop.f32.mrb[21].mxu1  ;;  %v1125_v53 = vadd.f32 %v1124_v49, %v3462_v29  ;;  %v2500_v54 = vpop.f32.mrb[105].mxu0 }
 0x1cf   :  { %2665 = vmatprep.subr.bf16.mxu1 %v2664_v46  ;;  %v852_v56 = vadd.f32 %v851_v51, %v3464_v27  ;;  %v853_v58 = vpop.f32.mrb[22].mxu1  ;;  %v1127_v59 = vpop.f32.mrb[106].mxu0 }
 0x1d0   :  { %2667 = vmatpush1.bf16.msra.mxu1 %v2666_v44  ;;  %v854_v61 = vadd.f32 %v853_v58, %v3460_v26  ;;  %v855_v0 = vpop.f32.mrb[23].mxu1  ;;  %v1128_v2 = vadd.f32 %v1127_v59, %v3462_v29  ;;  %v2501_v3 = vpop.f32.mrb[107].mxu0  ;;  %v1316_v5 = vmax.f32 %v850_v50, 0.0  ;;  %v1318_v6 = vmax.f32 %v1125_v53, 0.0 }
 0x1d1   :  { %v856_v4 = vadd.f32 %v855_v0, %v3464_v27  ;;  %v1317_v9 = vmax.f32 %v852_v56, 0.0 }
 0x1d2   :  { %v1319_v7 = vmax.f32 %v854_v61, 0.0  ;;  %v1321_v8 = vmax.f32 %v1128_v2, 0.0 }
 0x1d3   :  { %v1320_v10 = vmax.f32 %v856_v4, 0.0 }
 0x1d4   :  { %v2670_v11 = vpack.c.bf16 %v1319_v7, %v1316_v5  ;;  %v3512_v12 = vpack.c.bf16 %v1321_v8, %v1318_v6 }
 0x1d5   :  { %v2668_v13 = vpack.c.bf16 %v1320_v10, %v1317_v9  ;;  %v859_v14 = vpop.f32.mrb[24].mxu1  ;;  %v1132_v15 = vpop.f32.mrb[108].mxu0 }
 0x1d6   :  { %v860_v16 = vadd.f32 %v859_v14, %v3460_v26  ;;  %v861_v17 = vpop.f32.mrb[25].mxu1  ;;  %v1133_v18 = vadd.f32 %v1132_v15, %v3462_v29  ;;  %v2504_v19 = vpop.f32.mrb[109].mxu0 }
 0x1d7   :  { %2669 = vmatprep.subr.bf16.mxu1 %v2668_v13  ;;  %v862_v21 = vadd.f32 %v861_v17, %v3464_v27  ;;  %v863_v22 = vpop.f32.mrb[26].mxu1  ;;  %v1135_v41 = vpop.f32.mrb[110].mxu0 }
 0x1d8   :  { %2671 = vmatpush1.bf16.msra.mxu1 %v2670_v11  ;;  %v864_v62 = vadd.f32 %v863_v22, %v3460_v26  ;;  %v865_v24 = vpop.f32.mrb[27].mxu1  ;;  %v1136_v25 = vadd.f32 %v1135_v41, %v3462_v29  ;;  %v2505_v60 = vpop.f32.mrb[111].mxu0  ;;  %v1322_v30 = vmax.f32 %v860_v16, 0.0  ;;  %v1324_v31 = vmax.f32 %v1133_v18, 0.0 }
 0x1d9   :  { %v866_v28 = vadd.f32 %v865_v24, %v3464_v27  ;;  %v1323_v34 = vmax.f32 %v862_v21, 0.0 }
 0x1da   :  { %v1325_v32 = vmax.f32 %v864_v62, 0.0  ;;  %v1327_v33 = vmax.f32 %v1136_v25, 0.0 }
 0x1db   :  { %v1326_v35 = vmax.f32 %v866_v28, 0.0 }
 0x1dc   :  { %v2674_v36 = vpack.c.bf16 %v1325_v32, %v1322_v30  ;;  %v3520_v37 = vpack.c.bf16 %v1327_v33, %v1324_v31 }
 0x1dd   :  { %v2672_v38 = vpack.c.bf16 %v1326_v35, %v1323_v34  ;;  %v869_v39 = vpop.f32.mrb[28].mxu1  ;;  %v1140_v40 = vpop.f32.mrb[112].mxu0 }
 0x1de   :  { %v870_v42 = vadd.f32 %v869_v39, %v3460_v26  ;;  %v871_v43 = vpop.f32.mrb[29].mxu1  ;;  %v1141_v44 = vadd.f32 %v1140_v40, %v3462_v29  ;;  %v2508_v46 = vpop.f32.mrb[113].mxu0 }
 0x1df   :  { %2673 = vmatprep.subr.bf16.mxu1 %v2672_v38  ;;  %v872_v48 = vadd.f32 %v871_v43, %v3464_v27  ;;  %v873_v49 = vpop.f32.mrb[30].mxu1  ;;  %v1143_v50 = vpop.f32.mrb[114].mxu0 }
 0x1e0   :  { %2675 = vmatpush1.bf16.msra.mxu1 %v2674_v36  ;;  %v874_v51 = vadd.f32 %v873_v49, %v3460_v26  ;;  %v875_v53 = vpop.f32.mrb[31].mxu1  ;;  %v1144_v54 = vadd.f32 %v1143_v50, %v3462_v29  ;;  %v2509_v56 = vpop.f32.mrb[115].mxu0  ;;  %v1328_v59 = vmax.f32 %v870_v42, 0.0  ;;  %v1330_v61 = vmax.f32 %v1141_v44, 0.0 }
 0x1e1   :  { %v876_v58 = vadd.f32 %v875_v53, %v3464_v27  ;;  %v1329_v3 = vmax.f32 %v872_v48, 0.0 }
 0x1e2   :  { %v1331_v0 = vmax.f32 %v874_v51, 0.0  ;;  %v1333_v2 = vmax.f32 %v1144_v54, 0.0 }
 0x1e3   :  { %v1332_v4 = vmax.f32 %v876_v58, 0.0 }
 0x1e4   :  { %v2678_v5 = vpack.c.bf16 %v1331_v0, %v1328_v59  ;;  %v3528_v6 = vpack.c.bf16 %v1333_v2, %v1330_v61 }
 0x1e5   :  { %v2676_v7 = vpack.c.bf16 %v1332_v4, %v1329_v3  ;;  %v879_v8 = vpop.f32.mrb[32].mxu1  ;;  %v1148_v9 = vpop.f32.mrb[116].mxu0 }
 0x1e6   :  { %v880_v10 = vadd.f32 %v879_v8, %v3460_v26  ;;  %v881_v11 = vpop.f32.mrb[33].mxu1  ;;  %v1149_v13 = vadd.f32 %v1148_v9, %v3462_v29  ;;  %v2512_v14 = vpop.f32.mrb[117].mxu0 }
 0x1e7   :  { %2677 = vmatprep.subr.bf16.mxu1 %v2676_v7  ;;  %v882_v15 = vadd.f32 %v881_v11, %v3464_v27  ;;  %v883_v16 = vpop.f32.mrb[34].mxu1  ;;  %v1151_v17 = vpop.f32.mrb[118].mxu0  ;;  %v1447_v7 = vcombine.high %v3477_v52, %v3477_v52 }
 0x1e8   :  { %2679 = vmatpush1.bf16.msra.mxu1 %v2678_v5  ;;  %v884_v18 = vadd.f32 %v883_v16, %v3460_v26  ;;  %v885_v19 = vpop.f32.mrb[35].mxu1  ;;  %v1152_v21 = vadd.f32 %v1151_v17, %v3462_v29  ;;  %v2513_v22 = vpop.f32.mrb[119].mxu0  ;;  %v1334_v62 = vmax.f32 %v880_v10, 0.0  ;;  %v1336_v24 = vmax.f32 %v1149_v13, 0.0 }
 0x1e9   :  { %v886_v41 = vadd.f32 %v885_v19, %v3464_v27  ;;  %v1335_v28 = vmax.f32 %v882_v15, 0.0 }
 0x1ea   :  { %v1337_v25 = vmax.f32 %v884_v18, 0.0  ;;  %v1339_v60 = vmax.f32 %v1152_v21, 0.0  ;;  %v3555_v21 = vrot.slane %v1447_v7, %v3472_v47 }
 0x1eb   :  { %v1338_v30 = vmax.f32 %v886_v41, 0.0 }
 0x1ec   :  { %v2682_v31 = vpack.c.bf16 %v1337_v25, %v1334_v62  ;;  %v3536_v32 = vpack.c.bf16 %v1339_v60, %v1336_v24 }
 0x1ed   :  { %v2680_v33 = vpack.c.bf16 %v1338_v30, %v1335_v28  ;;  %v889_v34 = vpop.f32.mrb[36].mxu1  ;;  %v1156_v35 = vpop.f32.mrb[120].mxu0 }
 0x1ee   :  { %v890_v36 = vadd.f32 %v889_v34, %v3460_v26  ;;  %v891_v38 = vpop.f32.mrb[37].mxu1  ;;  %v1157_v39 = vadd.f32 %v1156_v35, %v3462_v29  ;;  %v2516_v40 = vpop.f32.mrb[121].mxu0 }
 0x1ef   :  { %2681 = vmatprep.subr.bf16.mxu1 %v2680_v33  ;;  %v892_v42 = vadd.f32 %v891_v38, %v3464_v27  ;;  %v893_v43 = vpop.f32.mrb[38].mxu1  ;;  %v1159_v44 = vpop.f32.mrb[122].mxu0 }
 0x1f0   :  { %2683 = vmatpush1.bf16.msra.mxu1 %v2682_v31  ;;  %v894_v46 = vadd.f32 %v893_v43, %v3460_v26  ;;  %v895_v48 = vpop.f32.mrb[39].mxu1  ;;  %v1160_v49 = vadd.f32 %v1159_v44, %v3462_v29  ;;  %v2517_v50 = vpop.f32.mrb[123].mxu0  ;;  %v1340_v53 = vmax.f32 %v890_v36, 0.0  ;;  %v1342_v54 = vmax.f32 %v1157_v39, 0.0 }
 0x1f1   :  { %v896_v51 = vadd.f32 %v895_v48, %v3464_v27  ;;  %v1341_v59 = vmax.f32 %v892_v42, 0.0 }
 0x1f2   :  { %v1343_v56 = vmax.f32 %v894_v46, 0.0  ;;  %v1345_v58 = vmax.f32 %v1160_v49, 0.0 }
 0x1f3   :  { %v1344_v61 = vmax.f32 %v896_v51, 0.0 }
 0x1f4   :  { %v2686_v0 = vpack.c.bf16 %v1343_v56, %v1340_v53  ;;  %v3544_v2 = vpack.c.bf16 %v1345_v58, %v1342_v54 }
 0x1f5   :  { %v2684_v3 = vpack.c.bf16 %v1344_v61, %v1341_v59  ;;  %v899_v4 = vpop.f32.mrb[40].mxu1  ;;  %v1164_v5 = vpop.f32.mrb[124].mxu0 }
 0x1f6   :  { %v900_v8 = vadd.f32 %v899_v4, %v3460_v26  ;;  %v901_v9 = vpop.f32.mrb[41].mxu1  ;;  %v1165_v10 = vadd.f32 %v1164_v5, %v3462_v29  ;;  %v2520_v11 = vpop.f32.mrb[125].mxu0 }
 0x1f7   :  { %2685 = vmatprep.subr.bf16.mxu1 %v2684_v3  ;;  %v902_v13 = vadd.f32 %v901_v9, %v3464_v27  ;;  %v903_v14 = vpop.f32.mrb[42].mxu1  ;;  %v1167_v15 = vpop.f32.mrb[126].mxu0 }
 0x1f8   :  { %2687 = vmatpush1.bf16.msra.mxu1 %v2686_v0  ;;  %v904_v16 = vadd.f32 %v903_v14, %v3460_v26  ;;  %v905_v17 = vpop.f32.mrb[43].mxu1  ;;  %v1168_v18 = vadd.f32 %v1167_v15, %v3462_v29  ;;  %v2521_v19 = vpop.f32.mrb[127].mxu0  ;;  %v1346_v22 = vmax.f32 %v900_v8, 0.0  ;;  %v1348_v41 = vmax.f32 %v1165_v10, 0.0 }
 0x1f9   :  { %v906_v52 = vadd.f32 %v905_v17, %v3464_v27  ;;  %v1347_v25 = vmax.f32 %v902_v13, 0.0 }
 0x1fa   :  { %v1349_v62 = vmax.f32 %v904_v16, 0.0  ;;  %v1351_v24 = vmax.f32 %v1168_v18, 0.0 }
 0x1fb   :  { %v1350_v60 = vmax.f32 %v906_v52, 0.0 }
 0x1fc   :  { %v2690_v28 = vpack.c.bf16 %v1349_v62, %v1346_v22  ;;  %v3557_v30 = vpack.c.bf16 %v1351_v24, %v1348_v41 }
 0x1fd   :  { %v2688_v31 = vpack.c.bf16 %v1350_v60, %v1347_v25  ;;  %v909_v33 = vpop.f32.mrb[44].mxu1  ;;  %v1172_v34 = vpop.f32.mrb[128].mxu0 }
 0x1fe   :  { %v910_v35 = vadd.f32 %v909_v33, %v3460_v26  ;;  %v911_v36 = vpop.f32.mrb[45].mxu1  ;;  %v1173_v38 = vadd.f32 %v1172_v34, %v3462_v29  ;;  %v2524_v39 = vpop.f32.mrb[129].mxu0 }
 0x1ff   :  { %2689 = vmatprep.subr.bf16.mxu1 %v2688_v31  ;;  %v912_v47 = vadd.f32 %v911_v36, %v3464_v27  ;;  %v913_v40 = vpop.f32.mrb[46].mxu1  ;;  %v1175_v42 = vpop.f32.mrb[130].mxu0 }
 0x200   :  { %2691 = vmatpush1.bf16.msra.mxu1 %v2690_v28  ;;  %v914_v43 = vadd.f32 %v913_v40, %v3460_v26  ;;  %v915_v44 = vpop.f32.mrb[47].mxu1  ;;  %v1176_v46 = vadd.f32 %v1175_v42, %v3462_v29  ;;  %v2525_v48 = vpop.f32.mrb[131].mxu0  ;;  %v1352_v50 = vmax.f32 %v910_v35, 0.0  ;;  %v1354_v51 = vmax.f32 %v1173_v38, 0.0 }
 0x201   :  { %v916_v49 = vadd.f32 %v915_v44, %v3464_v27  ;;  %v1353_v56 = vmax.f32 %v912_v47, 0.0 }
 0x202   :  { %v1355_v53 = vmax.f32 %v914_v43, 0.0  ;;  %v1357_v54 = vmax.f32 %v1176_v46, 0.0 }
 0x203   :  { %v1356_v58 = vmax.f32 %v916_v49, 0.0 }
 0x204   :  { %v2694_v59 = vpack.c.bf16 %v1355_v53, %v1352_v50  ;;  %v3565_v61 = vpack.c.bf16 %v1357_v54, %v1354_v51 }
 0x205   :  { %v2692_v0 = vpack.c.bf16 %v1356_v58, %v1353_v56  ;;  %v919_v3 = vpop.f32.mrb[48].mxu1  ;;  %v1180_v4 = vpop.f32.mrb[132].mxu0 }
 0x206   :  { %v920_v5 = vadd.f32 %v919_v3, %v3460_v26  ;;  %v921_v7 = vpop.f32.mrb[49].mxu1  ;;  %v1181_v8 = vadd.f32 %v1180_v4, %v3462_v29  ;;  %v2528_v9 = vpop.f32.mrb[133].mxu0 }
 0x207   :  { %2693 = vmatprep.subr.bf16.mxu1 %v2692_v0  ;;  %v922_v10 = vadd.f32 %v921_v7, %v3464_v27  ;;  %v923_v11 = vpop.f32.mrb[50].mxu1  ;;  %v1183_v13 = vpop.f32.mrb[134].mxu0 }
 0x208   :  { %2695 = vmatpush1.bf16.msra.mxu1 %v2694_v59  ;;  %v924_v14 = vadd.f32 %v923_v11, %v3460_v26  ;;  %v925_v15 = vpop.f32.mrb[51].mxu1  ;;  %v1184_v16 = vadd.f32 %v1183_v13, %v3462_v29  ;;  %v2529_v17 = vpop.f32.mrb[135].mxu0  ;;  %v1358_v19 = vmax.f32 %v920_v5, 0.0  ;;  %v1360_v52 = vmax.f32 %v1181_v8, 0.0 }
 0x209   :  { %v926_v18 = vadd.f32 %v925_v15, %v3464_v27  ;;  %v1359_v62 = vmax.f32 %v922_v10, 0.0 }
 0x20a   :  { %v1361_v22 = vmax.f32 %v924_v14, 0.0  ;;  %v1363_v41 = vmax.f32 %v1184_v16, 0.0 }
 0x20b   :  { %v1362_v24 = vmax.f32 %v926_v18, 0.0 }
 0x20c   :  { %v2698_v25 = vpack.c.bf16 %v1361_v22, %v1358_v19  ;;  %v3573_v60 = vpack.c.bf16 %v1363_v41, %v1360_v52 }
 0x20d   :  { %v2696_v28 = vpack.c.bf16 %v1362_v24, %v1359_v62  ;;  %v929_v31 = vpop.f32.mrb[52].mxu1  ;;  %v1188_v33 = vpop.f32.mrb[136].mxu0 }
 0x20e   :  { %v930_v34 = vadd.f32 %v929_v31, %v3460_v26  ;;  %v931_v35 = vpop.f32.mrb[53].mxu1  ;;  %v1189_v36 = vadd.f32 %v1188_v33, %v3462_v29  ;;  %v2532_v38 = vpop.f32.mrb[137].mxu0 }
 0x20f   :  { %v932_v39 = vadd.f32 %v931_v35, %v3464_v27  ;;  %v933_v47 = vpop.f32.mrb[54].mxu1  ;;  %2697 = vmatprep.subr.bf16.mxu1 %v2696_v28  ;;  %v1191_v40 = vpop.f32.mrb[138].mxu0 }
 0x210   :  { %v934_v42 = vadd.f32 %v933_v47, %v3460_v26  ;;  %v935_v43 = vpop.f32.mrb[55].mxu1  ;;  %v1192_v44 = vadd.f32 %v1191_v40, %v3462_v29  ;;  %2699 = vmatpush1.bf16.msra.mxu1 %v2698_v25  ;;  %v2533_v46 = vpop.f32.mrb[139].mxu0  ;;  %v1364_v49 = vmax.f32 %v930_v34, 0.0  ;;  %v1366_v50 = vmax.f32 %v1189_v36, 0.0 }
 0x211   :  { %v936_v48 = vadd.f32 %v935_v43, %v3464_v27  ;;  %v1365_v54 = vmax.f32 %v932_v39, 0.0 }
 0x212   :  { %v1367_v51 = vmax.f32 %v934_v42, 0.0  ;;  %v1369_v53 = vmax.f32 %v1192_v44, 0.0 }
 0x213   :  { %v1368_v56 = vmax.f32 %v936_v48, 0.0 }
 0x214   :  { %v2702_v58 = vpack.c.bf16 %v1367_v51, %v1364_v49  ;;  %v3581_v59 = vpack.c.bf16 %v1369_v53, %v1366_v50 }
 0x215   :  { %v2700_v0 = vpack.c.bf16 %v1368_v56, %v1365_v54  ;;  %v939_v3 = vpop.f32.mrb[56].mxu1  ;;  %v1196_v4 = vpop.f32.mrb[140].mxu0 }
 0x216   :  { %v940_v5 = vadd.f32 %v939_v3, %v3460_v26  ;;  %v941_v7 = vpop.f32.mrb[57].mxu1  ;;  %v1197_v8 = vadd.f32 %v1196_v4, %v3462_v29  ;;  %v2536_v9 = vpop.f32.mrb[141].mxu0 }
 0x217   :  { %v942_v10 = vadd.f32 %v941_v7, %v3464_v27  ;;  %v943_v11 = vpop.f32.mrb[58].mxu1  ;;  %2701 = vmatprep.subr.bf16.mxu1 %v2700_v0  ;;  %v1199_v13 = vpop.f32.mrb[142].mxu0 }
 0x218   :  { %v944_v14 = vadd.f32 %v943_v11, %v3460_v26  ;;  %v945_v15 = vpop.f32.mrb[59].mxu1  ;;  %v1200_v16 = vadd.f32 %v1199_v13, %v3462_v29  ;;  %2703 = vmatpush1.bf16.msra.mxu1 %v2702_v58  ;;  %v2537_v17 = vpop.f32.mrb[143].mxu0  ;;  %v1370_v19 = vmax.f32 %v940_v5, 0.0  ;;  %v1372_v52 = vmax.f32 %v1197_v8, 0.0 }
 0x219   :  { %v946_v18 = vadd.f32 %v945_v15, %v3464_v27  ;;  %v1371_v62 = vmax.f32 %v942_v10, 0.0 }
 0x21a   :  { %v1373_v22 = vmax.f32 %v944_v14, 0.0  ;;  %v1375_v41 = vmax.f32 %v1200_v16, 0.0 }
 0x21b   :  { %v1374_v24 = vmax.f32 %v946_v18, 0.0 }
 0x21c   :  { %v2706_v25 = vpack.c.bf16 %v1373_v22, %v1370_v19  ;;  %v3589_v28 = vpack.c.bf16 %v1375_v41, %v1372_v52 }
 0x21d   :  { %v2704_v31 = vpack.c.bf16 %v1374_v24, %v1371_v62  ;;  %v949_v33 = vpop.f32.mrb[60].mxu1  ;;  %v1204_v34 = vpop.f32.mrb[144].mxu0 }
 0x21e   :  { %v950_v35 = vadd.f32 %v949_v33, %v3460_v26  ;;  %v951_v36 = vpop.f32.mrb[61].mxu1  ;;  %v1205_v38 = vadd.f32 %v1204_v34, %v3462_v29  ;;  %v2540_v39 = vpop.f32.mrb[145].mxu0 }
 0x21f   :  { %v952_v47 = vadd.f32 %v951_v36, %v3464_v27  ;;  %v953_v40 = vpop.f32.mrb[62].mxu1  ;;  %2705 = vmatprep.subr.bf16.mxu1 %v2704_v31  ;;  %v1207_v42 = vpop.f32.mrb[146].mxu0 }
 0x220   :  { %v954_v43 = vadd.f32 %v953_v40, %v3460_v26  ;;  %v955_v44 = vpop.f32.mrb[63].mxu1  ;;  %v1208_v46 = vadd.f32 %v1207_v42, %v3462_v29  ;;  %2707 = vmatpush1.bf16.msra.mxu1 %v2706_v25  ;;  %v2541_v48 = vpop.f32.mrb[147].mxu0  ;;  %v1376_v50 = vmax.f32 %v950_v35, 0.0  ;;  %v1378_v51 = vmax.f32 %v1205_v38, 0.0 }
 0x221   :  { %v956_v49 = vadd.f32 %v955_v44, %v3464_v27  ;;  %v1377_v56 = vmax.f32 %v952_v47, 0.0 }
 0x222   :  { %v1379_v53 = vmax.f32 %v954_v43, 0.0  ;;  %v1381_v54 = vmax.f32 %v1208_v46, 0.0 }
 0x223   :  { %v1380_v58 = vmax.f32 %v956_v49, 0.0 }
 0x224   :  { %v2710_v0 = vpack.c.bf16 %v1379_v53, %v1376_v50  ;;  %v3597_v3 = vpack.c.bf16 %v1381_v54, %v1378_v51 }
 0x225   :  { %v2708_v4 = vpack.c.bf16 %v1380_v58, %v1377_v56  ;;  %v959_v5 = vpop.f32.mrb[64].mxu1  ;;  %v1212_v7 = vpop.f32.mrb[148].mxu0 }
 0x226   :  { %v960_v8 = vadd.f32 %v959_v5, %v3460_v26  ;;  %v961_v9 = vpop.f32.mrb[65].mxu1  ;;  %v1213_v10 = vadd.f32 %v1212_v7, %v3462_v29  ;;  %v2544_v11 = vpop.f32.mrb[149].mxu0 }
 0x227   :  { %v962_v13 = vadd.f32 %v961_v9, %v3464_v27  ;;  %v963_v14 = vpop.f32.mrb[66].mxu1  ;;  %2709 = vmatprep.subr.bf16.mxu1 %v2708_v4  ;;  %v1215_v15 = vpop.f32.mrb[150].mxu0 }
 0x228   :  { %v964_v16 = vadd.f32 %v963_v14, %v3460_v26  ;;  %v965_v17 = vpop.f32.mrb[67].mxu1  ;;  %v1216_v18 = vadd.f32 %v1215_v15, %v3462_v29  ;;  %2711 = vmatpush1.bf16.msra.mxu1 %v2710_v0  ;;  %v2545_v19 = vpop.f32.mrb[151].mxu0  ;;  %v1382_v22 = vmax.f32 %v960_v8, 0.0  ;;  %v1384_v62 = vmax.f32 %v1213_v10, 0.0 }
 0x229   :  { %v966_v52 = vadd.f32 %v965_v17, %v3464_v27  ;;  %v1383_v25 = vmax.f32 %v962_v13, 0.0 }
 0x22a   :  { %v1385_v41 = vmax.f32 %v964_v16, 0.0  ;;  %v1387_v24 = vmax.f32 %v1216_v18, 0.0 }
 0x22b   :  { %v1386_v31 = vmax.f32 %v966_v52, 0.0 }
 0x22c   :  { %v2714_v33 = vpack.c.bf16 %v1385_v41, %v1382_v22  ;;  %v3605_v34 = vpack.c.bf16 %v1387_v24, %v1384_v62  ;;  %v3622_v24 = vcombine.high %v3555_v21, %v3555_v21 }
 0x22d   :  { %v2712_v35 = vpack.c.bf16 %v1386_v31, %v1383_v25  ;;  %v969_v36 = vpop.f32.mrb[68].mxu1  ;;  %v1220_v38 = vpop.f32.mrb[152].mxu0 }
 0x22e   :  { %v970_v39 = vadd.f32 %v969_v36, %v3460_v26  ;;  %v971_v47 = vpop.f32.mrb[69].mxu1  ;;  %v1221_v40 = vadd.f32 %v1220_v38, %v3462_v29  ;;  %v2548_v42 = vpop.f32.mrb[153].mxu0 }
 0x22f   :  { %v972_v43 = vadd.f32 %v971_v47, %v3464_v27  ;;  %v973_v44 = vpop.f32.mrb[70].mxu1  ;;  %2713 = vmatprep.subr.bf16.mxu1 %v2712_v35  ;;  %v1223_v46 = vpop.f32.mrb[154].mxu0 }
 0x230   :  { %v974_v48 = vadd.f32 %v973_v44, %v3460_v26  ;;  %v975_v49 = vpop.f32.mrb[71].mxu1  ;;  %2715 = vmatpush1.bf16.msra.mxu1 %v2714_v33  ;;  %v1224_v50 = vadd.f32 %v1223_v46, %v3462_v29  ;;  %v2549_v51 = vpop.f32.mrb[155].mxu0  ;;  %v1388_v54 = vmax.f32 %v970_v39, 0.0  ;;  %v1390_v58 = vmax.f32 %v1221_v40, 0.0 }
 0x231   :  { %v976_v53 = vadd.f32 %v975_v49, %v3464_v27  ;;  %v1389_v4 = vmax.f32 %v972_v43, 0.0 }
 0x232   :  { %v1391_v56 = vmax.f32 %v974_v48, 0.0  ;;  %v1393_v0 = vmax.f32 %v1224_v50, 0.0 }
 0x233   :  { %v1392_v5 = vmax.f32 %v976_v53, 0.0 }
 0x234   :  { %v2718_v7 = vpack.c.bf16 %v1391_v56, %v1388_v54  ;;  %v3613_v8 = vpack.c.bf16 %v1393_v0, %v1390_v58 }
 0x235   :  { %v2716_v9 = vpack.c.bf16 %v1392_v5, %v1389_v4  ;;  %v979_v10 = vpop.f32.mrb[72].mxu1  ;;  %v1228_v11 = vpop.f32.mrb[156].mxu0 }
 0x236   :  { %v980_v13 = vadd.f32 %v979_v10, %v3460_v26  ;;  %v981_v14 = vpop.f32.mrb[73].mxu1  ;;  %v1229_v15 = vadd.f32 %v1228_v11, %v3462_v29  ;;  %v2552_v16 = vpop.f32.mrb[157].mxu0 }
 0x237   :  { %v982_v17 = vadd.f32 %v981_v14, %v3464_v27  ;;  %v983_v18 = vpop.f32.mrb[74].mxu1  ;;  %2717 = vmatprep.subr.bf16.mxu1 %v2716_v9  ;;  %v1231_v19 = vpop.f32.mrb[158].mxu0 }
 0x238   :  { %v984_v52 = vadd.f32 %v983_v18, %v3460_v26  ;;  %v985_v22 = vpop.f32.mrb[75].mxu1  ;;  %2719 = vmatpush1.bf16.msra.mxu1 %v2718_v7  ;;  %v1232_v41 = vadd.f32 %v1231_v19, %v3462_v29  ;;  %v2553_v62 = vpop.f32.mrb[159].mxu0  ;;  %v1394_v31 = vmax.f32 %v980_v13, 0.0  ;;  %v1396_v35 = vmax.f32 %v1229_v15, 0.0 }
 0x239   :  { %v986_v25 = vadd.f32 %v985_v22, %v3464_v27  ;;  %v1395_v38 = vmax.f32 %v982_v17, 0.0 }
 0x23a   :  { %v1397_v33 = vmax.f32 %v984_v52, 0.0  ;;  %v1399_v36 = vmax.f32 %v1232_v41, 0.0 }
 0x23b   :  { %v1398_v39 = vmax.f32 %v986_v25, 0.0  ;;  %1535 = vmatmul.mubr.f32.vlgmr.msra.gmra.mrb[108].mxu1 %v3481_v55 }
 0x23c   :  { %v2722_v47 = vpack.c.bf16 %v1397_v33, %v1394_v31  ;;  %v3626_v40 = vpack.c.bf16 %v1399_v36, %v1396_v35  ;;  %2212 = vmatprep.mubr.msk.f32.mxu1 %vm1467_vm4, %v3622_v24 }
 0x23d   :  { %v2720_v42 = vpack.c.bf16 %v1398_v39, %v1395_v38  ;;  %v989_v43 = vpop.f32.mrb[76].mxu1  ;;  %v1236_v44 = vpop.f32.mrb[160].mxu0 }
 0x23e   :  { %v990_v46 = vadd.f32 %v989_v43, %v3460_v26  ;;  %v991_v48 = vpop.f32.mrb[77].mxu1  ;;  %v1237_v49 = vadd.f32 %v1236_v44, %v3462_v29  ;;  %v2556_v50 = vpop.f32.mrb[161].mxu0 }
 0x23f   :  { %v992_v51 = vadd.f32 %v991_v48, %v3464_v27  ;;  %v993_v53 = vpop.f32.mrb[78].mxu1  ;;  %2721 = vmatprep.subr.bf16.mxu1 %v2720_v42  ;;  %v1239_v54 = vpop.f32.mrb[162].mxu0 }
 0x240   :  { %v994_v56 = vadd.f32 %v993_v53, %v3460_v26  ;;  %v995_v58 = vpop.f32.mrb[79].mxu1  ;;  %2723 = vmatpush1.bf16.msra.mxu1 %v2722_v47  ;;  %v1240_v0 = vadd.f32 %v1239_v54, %v3462_v29  ;;  %v2557_v4 = vpop.f32.mrb[163].mxu0  ;;  %v1400_v7 = vmax.f32 %v990_v46, 0.0  ;;  %v1402_v10 = vmax.f32 %v1237_v49, 0.0 }
 0x241   :  { %v996_v5 = vadd.f32 %v995_v58, %v3464_v27  ;;  %v1401_v13 = vmax.f32 %v992_v51, 0.0 }
 0x242   :  { %v1403_v9 = vmax.f32 %v994_v56, 0.0  ;;  %v1405_v11 = vmax.f32 %v1240_v0, 0.0 }
 0x243   :  { %v1404_v14 = vmax.f32 %v996_v5, 0.0 }
 0x244   :  { %v2726_v15 = vpack.c.bf16 %v1403_v9, %v1400_v7  ;;  %v3636_v16 = vpack.c.bf16 %v1405_v11, %v1402_v10 }
 0x245   :  { %v2724_v17 = vpack.c.bf16 %v1404_v14, %v1401_v13  ;;  %v999_v18 = vpop.f32.mrb[80].mxu1  ;;  %v1244_v19 = vpop.f32.mrb[164].mxu0 }
 0x246   :  { %v1000_v52 = vadd.f32 %v999_v18, %v3460_v26  ;;  %v1001_v22 = vpop.f32.mrb[81].mxu1  ;;  %v1245_v41 = vadd.f32 %v1244_v19, %v3462_v29  ;;  %v2560_v62 = vpop.f32.mrb[165].mxu0 }
 0x247   :  { %v1002_v25 = vadd.f32 %v1001_v22, %v3464_v27  ;;  %v1003_v31 = vpop.f32.mrb[82].mxu1  ;;  %2725 = vmatprep.subr.bf16.mxu1 %v2724_v17  ;;  %v1247_v33 = vpop.f32.mrb[166].mxu0 }
 0x248   :  { %v1004_v35 = vadd.f32 %v1003_v31, %v3460_v26  ;;  %v1005_v36 = vpop.f32.mrb[83].mxu1  ;;  %2727 = vmatpush1.bf16.msra.mxu1 %v2726_v15  ;;  %v1248_v38 = vadd.f32 %v1247_v33, %v3462_v29  ;;  %v2561_v39 = vpop.f32.mrb[167].mxu0  ;;  %v1406_v42 = vmax.f32 %v1000_v52, 0.0  ;;  %v1408_v44 = vmax.f32 %v1245_v41, 0.0 }
 0x249   :  { %v1006_v47 = vadd.f32 %v1005_v36, %v3464_v27  ;;  %v1407_v48 = vmax.f32 %v1002_v25, 0.0 }
 0x24a   :  { %v1409_v43 = vmax.f32 %v1004_v35, 0.0  ;;  %v1411_v46 = vmax.f32 %v1248_v38, 0.0 }
 0x24b   :  { %v1410_v49 = vmax.f32 %v1006_v47, 0.0 }
 0x24c   :  { %v2730_v50 = vpack.c.bf16 %v1409_v43, %v1406_v42  ;;  %v3644_v51 = vpack.c.bf16 %v1411_v46, %v1408_v44 }
 0x24d   :  { %v2728_v53 = vpack.c.bf16 %v1410_v49, %v1407_v48  ;;  %v1009_v54 = vpop.f32.mrb[84].mxu1  ;;  %v1252_v56 = vpop.f32.mrb[168].mxu0 }
 0x24e   :  { %v1010_v58 = vadd.f32 %v1009_v54, %v3460_v26  ;;  %v1011_v0 = vpop.f32.mrb[85].mxu1  ;;  %v1253_v4 = vadd.f32 %v1252_v56, %v3462_v29  ;;  %v2564_v5 = vpop.f32.mrb[169].mxu0 }
 0x24f   :  { %v1012_v7 = vadd.f32 %v1011_v0, %v3464_v27  ;;  %v1013_v9 = vpop.f32.mrb[86].mxu1  ;;  %2729 = vmatprep.subr.bf16.mxu1 %v2728_v53  ;;  %v1255_v10 = vpop.f32.mrb[170].mxu0 }
 0x250   :  { %v1014_v11 = vadd.f32 %v1013_v9, %v3460_v26  ;;  %v1015_v13 = vpop.f32.mrb[87].mxu1  ;;  %2731 = vmatpush1.bf16.msra.mxu1 %v2730_v50  ;;  %v1256_v14 = vadd.f32 %v1255_v10, %v3462_v29  ;;  %v2565_v15 = vpop.f32.mrb[171].mxu0  ;;  %v1412_v18 = vmax.f32 %v1010_v58, 0.0  ;;  %v1414_v52 = vmax.f32 %v1253_v4, 0.0 }
 0x251   :  { %v1016_v17 = vadd.f32 %v1015_v13, %v3464_v27  ;;  %v1413_v41 = vmax.f32 %v1012_v7, 0.0 }
 0x252   :  { %v1415_v19 = vmax.f32 %v1014_v11, 0.0  ;;  %v1417_v22 = vmax.f32 %v1256_v14, 0.0 }
 0x253   :  { %v1416_v62 = vmax.f32 %v1016_v17, 0.0 }
 0x254   :  { %v2734_v25 = vpack.c.bf16 %v1415_v19, %v1412_v18  ;;  %v3652_v31 = vpack.c.bf16 %v1417_v22, %v1414_v52 }
 0x255   :  { %v2732_v33 = vpack.c.bf16 %v1416_v62, %v1413_v41  ;;  %v1019_v35 = vpop.f32.mrb[88].mxu1  ;;  %v1260_v36 = vpop.f32.mrb[172].mxu0 }
 0x256   :  { %v1020_v38 = vadd.f32 %v1019_v35, %v3460_v26  ;;  %v1021_v39 = vpop.f32.mrb[89].mxu1  ;;  %v1261_v47 = vadd.f32 %v1260_v36, %v3462_v29  ;;  %v2568_v42 = vpop.f32.mrb[173].mxu0 }
 0x257   :  { %v1022_v43 = vadd.f32 %v1021_v39, %v3464_v27  ;;  %v1023_v44 = vpop.f32.mrb[90].mxu1  ;;  %2733 = vmatprep.subr.bf16.mxu1 %v2732_v33  ;;  %v1263_v46 = vpop.f32.mrb[174].mxu0 }
 0x258   :  { %v1024_v48 = vadd.f32 %v1023_v44, %v3460_v26  ;;  %v1025_v49 = vpop.f32.mrb[91].mxu1  ;;  %2735 = vmatpush1.bf16.msra.mxu1 %v2734_v25  ;;  %v1264_v50 = vadd.f32 %v1263_v46, %v3462_v29  ;;  %v2569_v53 = vpop.f32.mrb[175].mxu0  ;;  %v1418_v56 = vmax.f32 %v1020_v38, 0.0  ;;  %v1420_v0 = vmax.f32 %v1261_v47, 0.0 }
 0x259   :  { %v1026_v54 = vadd.f32 %v1025_v49, %v3464_v27  ;;  %v1419_v5 = vmax.f32 %v1022_v43, 0.0 }
 0x25a   :  { %v1421_v58 = vmax.f32 %v1024_v48, 0.0  ;;  %v1423_v4 = vmax.f32 %v1264_v50, 0.0 }
 0x25b   :  { %v1422_v7 = vmax.f32 %v1026_v54, 0.0 }
 0x25c   :  { %v2738_v9 = vpack.c.bf16 %v1421_v58, %v1418_v56  ;;  %v3660_v10 = vpack.c.bf16 %v1423_v4, %v1420_v0 }
 0x25d   :  { %v2736_v11 = vpack.c.bf16 %v1422_v7, %v1419_v5  ;;  %v1029_v13 = vpop.f32.mrb[92].mxu1  ;;  %v1268_v14 = vpop.f32.mrb[176].mxu0 }
 0x25e   :  { %v1030_v15 = vadd.f32 %v1029_v13, %v3460_v26  ;;  %v1031_v17 = vpop.f32.mrb[93].mxu1  ;;  %v1269_v18 = vadd.f32 %v1268_v14, %v3462_v29  ;;  %v2572_v19 = vpop.f32.mrb[177].mxu0 }
 0x25f   :  { %v1032_v52 = vadd.f32 %v1031_v17, %v3464_v27  ;;  %v1033_v22 = vpop.f32.mrb[94].mxu1  ;;  %2737 = vmatprep.subr.bf16.mxu1 %v2736_v11  ;;  %v1271_v41 = vpop.f32.mrb[178].mxu0 }
 0x260   :  { %v1034_v62 = vadd.f32 %v1033_v22, %v3460_v26  ;;  %v1035_v25 = vpop.f32.mrb[95].mxu1  ;;  %2739 = vmatpush1.bf16.msra.mxu1 %v2738_v9  ;;  %v1272_v33 = vadd.f32 %v1271_v41, %v3462_v29  ;;  %v2573_v35 = vpop.f32.mrb[179].mxu0  ;;  %v1424_v38 = vmax.f32 %v1030_v15, 0.0  ;;  %v1426_v47 = vmax.f32 %v1269_v18, 0.0 }
 0x261   :  { %v1036_v36 = vadd.f32 %v1035_v25, %v3464_v27  ;;  %v1425_v43 = vmax.f32 %v1032_v52, 0.0 }
 0x262   :  { %v1427_v39 = vmax.f32 %v1034_v62, 0.0  ;;  %v1429_v42 = vmax.f32 %v1272_v33, 0.0 }
 0x263   :  { %v1428_v44 = vmax.f32 %v1036_v36, 0.0 }
 0x264   :  { %v2742_v46 = vpack.c.bf16 %v1427_v39, %v1424_v38  ;;  %v3668_v48 = vpack.c.bf16 %v1429_v42, %v1426_v47 }
 0x265   :  { %v2740_v49 = vpack.c.bf16 %v1428_v44, %v1425_v43  ;;  %v1039_v50 = vpop.f32.mrb[96].mxu1  ;;  %v1276_v53 = vpop.f32.mrb[180].mxu0 }
 0x266   :  { %v1040_v54 = vadd.f32 %v1039_v50, %v3460_v26  ;;  %v1041_v56 = vpop.f32.mrb[97].mxu1  ;;  %v1277_v58 = vadd.f32 %v1276_v53, %v3462_v29  ;;  %v2576_v0 = vpop.f32.mrb[181].mxu0 }
 0x267   :  { %v1042_v4 = vadd.f32 %v1041_v56, %v3464_v27  ;;  %v1043_v5 = vpop.f32.mrb[98].mxu1  ;;  %2741 = vmatprep.subr.bf16.mxu1 %v2740_v49  ;;  %v1279_v7 = vpop.f32.mrb[182].mxu0 }
 0x268   :  { %v1044_v9 = vadd.f32 %v1043_v5, %v3460_v26  ;;  %v1045_v11 = vpop.f32.mrb[99].mxu1  ;;  %2743 = vmatpush1.bf16.msra.mxu1 %v2742_v46  ;;  %v1280_v13 = vadd.f32 %v1279_v7, %v3462_v29  ;;  %v2577_v14 = vpop.f32.mrb[183].mxu0  ;;  %v1430_v17 = vmax.f32 %v1040_v54, 0.0  ;;  %v1432_v19 = vmax.f32 %v1277_v58, 0.0 }
 0x269   :  { %v1046_v15 = vadd.f32 %v1045_v11, %v3464_v27  ;;  %v1431_v22 = vmax.f32 %v1042_v4, 0.0 }
 0x26a   :  { %v1433_v18 = vmax.f32 %v1044_v9, 0.0  ;;  %v1435_v52 = vmax.f32 %v1280_v13, 0.0 }
 0x26b   :  { %v1434_v41 = vmax.f32 %v1046_v15, 0.0 }
 0x26c   :  { %v2746_v62 = vpack.c.bf16 %v1433_v18, %v1430_v17  ;;  %v3676_v25 = vpack.c.bf16 %v1435_v52, %v1432_v19 }
 0x26d   :  { %v2744_v33 = vpack.c.bf16 %v1434_v41, %v1431_v22  ;;  %v1049_v35 = vpop.f32.mrb[100].mxu1  ;;  %v1284_v36 = vpop.f32.mrb[184].mxu0 }
 0x26e   :  { %v1050_v38 = vadd.f32 %v1049_v35, %v3460_v26  ;;  %v1051_v39 = vpop.f32.mrb[101].mxu1  ;;  %v1285_v47 = vadd.f32 %v1284_v36, %v3462_v29  ;;  %v2580_v42 = vpop.f32.mrb[185].mxu0 }
 0x26f   :  { %v1052_v43 = vadd.f32 %v1051_v39, %v3464_v27  ;;  %v1053_v44 = vpop.f32.mrb[102].mxu1  ;;  %2745 = vmatprep.subr.bf16.mxu1 %v2744_v33  ;;  %v1287_v46 = vpop.f32.mrb[186].mxu0 }
 0x270   :  { %v1054_v49 = vadd.f32 %v1053_v44, %v3460_v26  ;;  %v1055_v50 = vpop.f32.mrb[103].mxu1  ;;  %2747 = vmatpush1.bf16.msra.mxu1 %v2746_v62  ;;  %v1288_v53 = vadd.f32 %v1287_v46, %v3462_v29  ;;  %v2581_v54 = vpop.f32.mrb[187].mxu0  ;;  %v1436_v58 = vmax.f32 %v1050_v38, 0.0  ;;  %v1438_v4 = vmax.f32 %v1285_v47, 0.0 }
 0x271   :  { %v1056_v56 = vadd.f32 %v1055_v50, %v3464_v27  ;;  %v1437_v7 = vmax.f32 %v1052_v43, 0.0  ;;  %v1847_v46 = vand.u32 127, %v630_v23  ;;  %v1862_v23 = vld [vmem:[%s3984_s8 + $0x8] sm:$0xff] }
 0x272   :  { %v1439_v0 = vmax.f32 %v1054_v49, 0.0  ;;  %v1441_v5 = vmax.f32 %v1288_v53, 0.0  ;;  %v2214_v49 = vld [vmem:[%s3983_s7] ss:$0 sm:$0xff] }
 0x273   :  { %v1440_v9 = vmax.f32 %v1056_v56, 0.0  ;;  %vm1848_vm5 = vcmp.lt.s32.totalorder %v1847_v46, 8  ;;  %v1969_v46 = vld [vmem:[%s3986_s10 + $0x40] sm:$0xff] }
 0x274   :  { %v2750_v11 = vpack.c.bf16 %v1439_v0, %v1436_v58  ;;  %v2806_v13 = vpack.c.bf16 %v1441_v5, %v1438_v4  ;;  %v1861_v58 = vld [vmem:[%s3984_s8] sm:$0xff]  ;;  %v1863_v0 = vld [vmem:[%s3984_s8 + $0x10] sm:$0xff]  ;;  %v1864_v5 = vld [vmem:[%s3984_s8 + $0x18] sm:$0xff] }
 0x275   :  { %v2748_v14 = vpack.c.bf16 %v1440_v9, %v1437_v7  ;;  %v1059_v15 = vpop.f32.mrb[104].mxu1  ;;  %v1292_v17 = vpop.f32.mrb[188].mxu0  ;;  %v2833_v4 = vpack.c.bf16 %v1862_v23, %v1861_v58  ;;  %v2836_v7 = vpack.c.bf16 %v1864_v5, %v1863_v0  ;;  %v1865_v9 = vld [vmem:[%s3984_s8 + $0x20] sm:$0xff]  ;;  %v1988_v58 = vld [vmem:[%s3986_s10 + $0xd8] sm:$0xff]  ;;  %v1971_v0 = vld [vmem:[%s3986_s10 + $0x50] sm:$0xff] }
 0x276   :  { %v1060_v18 = vadd.f32 %v1059_v15, %v3460_v26  ;;  %v1061_v19 = vpop.f32.mrb[105].mxu1  ;;  %v2584_v52 = vpop.f32.mrb[189].mxu0  ;;  %v3001_v26 = vmov 0.0|0.0   ;;  %v1868_v15 = vld [vmem:[%s3984_s8 + $0x38] sm:$0xff] }
 0x277   :  { %v1062_v22 = vadd.f32 %v1061_v19, %v3464_v27  ;;  %2749 = vmatprep.subr.bf16.mxu1 %v2748_v14  ;;  %v1063_v41 = vpop.f32.mrb[106].mxu1  ;;  %v1295_v62 = vpop.f32.mrb[190].mxu0  ;;  %v1293_v27 = vadd.f32 %v1292_v17, %v3462_v29  ;;  %v1755_v29 = vld [vmem:[%s3982_s6 + $0x18] sm:$0xff]  ;;  %v1867_v14 = vld [vmem:[%s3984_s8 + $0x30] sm:$0xff]  ;;  %v1870_v19 = vld [vmem:[%s3984_s8 + $0x48] sm:$0xff] }
 0x278   :  { %2751 = vmatpush1.bf16.msra.mxu1 %v2750_v11  ;;  %v1064_v33 = vpop.f32.mrb[107].mxu1  ;;  %v2585_v35 = vpop.f32.mrb[191].mxu0  ;;  %v1442_v38 = vmax.f32 %v1060_v18, 0.0  ;;  %v1866_v11 = vld [vmem:[%s3984_s8 + $0x28] sm:$0xff]  ;;  %v2842_v17 = vpack.c.bf16 %v1868_v15, %v1867_v14  ;;  %v1869_v18 = vld [vmem:[%s3984_s8 + $0x40] sm:$0xff]  ;;  %v1991_v15 = vld [vmem:[%s3986_s10 + $0xf0] sm:$0xff] }
 0x279   :  { %v1443_v36 = vmax.f32 %v1062_v22, 0.0  ;;  %v2845_v52 = vpack.c.bf16 %v1870_v19, %v1869_v18  ;;  %v1974_v14 = vld [vmem:[%s3986_s10 + $0x68] sm:$0xff] }
 0x27b   :  { %1573 = vmatprep.subr.mxu1 %v1443_v36  ;;  %v1871_v36 = vld [vmem:[%s3984_s8 + $0x50] sm:$0xff] }
 0x27c   :  { %1574 = vmatpush1.msra.mxu1 %v1442_v38  ;;  %v1872_v38 = vld [vmem:[%s3984_s8 + $0x58] sm:$0xff] }
 0x27d   :  { %1606 = vmatmul.mubr.f32.vlgmr.msra.gmra.mrb[108].mxu1 %v3555_v21  ;;  %2753 = vmatprep.subr.bf16.mxu1 %v3557_v30 }
 0x27e   :  { %2755 = vmatpush3.bf16.msra.mxu1 %v3483_v57  ;;  %1676 = vmatprep.mubr.f32.mxu1 %v3487_v63  ;;  %v1753_v57 = vld [vmem:[%s3982_s6 + $0x8] sm:$0xff]  ;;  %v1444_v63 = vmax.f32 %v1293_v27, 0.0  ;;  %v2848_v27 = vpack.c.bf16 %v1872_v38, %v1871_v36 }
 0x27f   :  { %2757 = vmatprep.subr.bf16.mxu1 %v3565_v61  ;;  %v1760_v61 = vld [vmem:[%s3982_s6 + $0x40] sm:$0xff] }
 0x282   :  { %2759 = vmatpush3.bf16.msra.mxu1 %v3496_v20 }
 0x283   :  { %2761 = vmatprep.subr.bf16.mxu1 %v3573_v60  ;;  %v1761_v60 = vld [vmem:[%s3982_s6 + $0x48] sm:$0xff] }
 0x286   :  { %2763 = vmatpush3.bf16.msra.mxu1 %v3504_v45  ;;  %v1754_v45 = vld [vmem:[%s3982_s6 + $0x10] sm:$0xff] }
 0x287   :  { %2765 = vmatprep.subr.bf16.mxu1 %v3581_v59  ;;  %v2821_v59 = vpack.c.bf16 %v1761_v60, %v1760_v61  ;;  %v1963_v60 = vld [vmem:[%s3986_s10 + $0x10] sm:$0xff] }
 0x28a   :  { %2767 = vmatpush3.bf16.msra.mxu1 %v3512_v12  ;;  %v2812_v12 = vpack.c.bf16 %v1755_v29, %v1754_v45  ;;  %v1876_v45 = vld [vmem:[%s3984_s8 + $0x78] sm:$0xff] }
 0x28b   :  { %2769 = vmatprep.subr.bf16.mxu1 %v3589_v28  ;;  %v1762_v28 = vld [vmem:[%s3982_s6 + $0x50] sm:$0xff] }
 0x28e   :  { %2771 = vmatpush3.bf16.msra.mxu1 %v3520_v37  ;;  %v1756_v37 = vld [vmem:[%s3982_s6 + $0x20] sm:$0xff] }
 0x28f   :  { %2773 = vmatprep.subr.bf16.mxu1 %v3597_v3  ;;  %v1763_v3 = vld [vmem:[%s3982_s6 + $0x58] sm:$0xff] }
 0x292   :  { %2775 = vmatpush3.bf16.msra.mxu1 %v3528_v6  ;;  %v1757_v6 = vld [vmem:[%s3982_s6 + $0x28] sm:$0xff] }
 0x293   :  { %2777 = vmatprep.subr.bf16.mxu1 %v3605_v34  ;;  %v2824_v34 = vpack.c.bf16 %v1763_v3, %v1762_v28  ;;  %v1981_v28 = vld [vmem:[%s3986_s10 + $0xa0] sm:$0xff]  ;;  %v1982_v3 = vld [vmem:[%s3986_s10 + $0xa8] sm:$0xff] }
 0x296   :  { %2779 = vmatpush3.bf16.msra.mxu1 %v3536_v32  ;;  %v2815_v32 = vpack.c.bf16 %v1757_v6, %v1756_v37  ;;  %v1978_v37 = vld [vmem:[%s3986_s10 + $0x88] sm:$0xff]  ;;  %v1961_v6 = vld [vmem:[%s3986_s10] sm:$0xff] }
 0x297   :  { %2781 = vmatprep.subr.bf16.mxu1 %v3613_v8  ;;  %v1764_v8 = vld [vmem:[%s3982_s6 + $0x60] sm:$0xff] }
 0x29a   :  { %2783 = vmatpush3.bf16.msra.mxu1 %v3544_v2  ;;  %v1758_v2 = vld [vmem:[%s3982_s6 + $0x30] sm:$0xff] }
 0x29b   :  { %2784 = vmatprep.subr.bf16.mxu1 %v3001_v26 }
 0x29d   :  { %1677 = vmatmul.mubr.f32.vlgmr.msra.gmra.mrb[110].mxu1 %v3481_v55  ;;  %v1752_v55 = vld [vmem:[%s3982_s6] sm:$0xff] }
 0x29e   :  { %2786 = vmatpush1.bf16.msra.mxu1 %v3626_v40  ;;  %2213 = vmatprep.mubr.msk.f32.mxu1 %vm1467_vm4, %v3622_v24  ;;  %v2809_v20 = vpack.c.bf16 %v1753_v57, %v1752_v55  ;;  %v1765_v24 = vld [vmem:[%s3982_s6 + $0x68] sm:$0xff]  ;;  %v1873_v55 = vld [vmem:[%s3984_s8 + $0x60] sm:$0xff] }
 0x29f   :  { %2787 = vmatprep.subr.bf16.mxu1 %v3001_v26  ;;  %v2827_v40 = vpack.c.bf16 %v1765_v24, %v1764_v8  ;;  %v1874_v57 = vld [vmem:[%s3984_s8 + $0x68] sm:$0xff]  ;;  %v2864_v8 = vpack.c.bf16 %v1982_v3, %v1981_v28  ;;  %v1965_v24 = vld [vmem:[%s3986_s10 + $0x20] sm:$0xff] }
 0x2a2   :  { %2789 = vmatpush1.bf16.msra.mxu1 %v3636_v16  ;;  %v1766_v16 = vld [vmem:[%s3982_s6 + $0x70] sm:$0xff] }
 0x2a3   :  { %2790 = vmatprep.subr.bf16.mxu1 %v3001_v26 }
 0x2a6   :  { %2792 = vmatpush1.bf16.msra.mxu1 %v3644_v51  ;;  %v1767_v51 = vld [vmem:[%s3982_s6 + $0x78] sm:$0xff] }
 0x2a7   :  { %2793 = vmatprep.subr.bf16.mxu1 %v3001_v26 }
 0x2aa   :  { %2795 = vmatpush1.bf16.msra.mxu1 %v3652_v31  ;;  %v2830_v31 = vpack.c.bf16 %v1767_v51, %v1766_v16  ;;  %v1983_v16 = vld [vmem:[%s3986_s10 + $0xb0] sm:$0xff]  ;;  %v1984_v51 = vld [vmem:[%s3986_s10 + $0xb8] sm:$0xff] }
 0x2ab   :  { %2796 = vmatprep.subr.bf16.mxu1 %v3001_v26 }
 0x2ae   :  { %2798 = vmatpush1.bf16.msra.mxu1 %v3660_v10 }
 0x2af   :  { %2799 = vmatprep.subr.bf16.mxu1 %v3001_v26 }
 0x2b2   :  { %2801 = vmatpush1.bf16.msra.mxu1 %v3668_v48 }
 0x2b3   :  { %2802 = vmatprep.subr.bf16.mxu1 %v3001_v26 }
 0x2b6   :  { %2804 = vmatpush1.bf16.msra.mxu1 %v3676_v25 }
 0x2b7   :  { %2805 = vmatprep.subr.bf16.mxu1 %v3001_v26 }
 0x2ba   :  { %2807 = vmatpush1.bf16.msra.mxu1 %v2806_v13  ;;  %v2839_v13 = vpack.c.bf16 %v1866_v11, %v1865_v9  ;;  %v1990_v9 = vld [vmem:[%s3986_s10 + $0xe8] sm:$0xff]  ;;  %v1973_v11 = vld [vmem:[%s3986_s10 + $0x60] sm:$0xff] }
 0x2bb   :  { %1714 = vmatprep.subr.mxu1 %v2997_v1  ;;  %v2882_v18 = vpack.c.bf16 %v1974_v14, %v1973_v11 }
 0x2be   :  { %1715 = vmatpush1.msra.mxu1 %v1444_v63  ;;  %v2851_v63 = vpack.c.bf16 %v1874_v57, %v1873_v55 }
 0x2bf   :  { %2808 = vmatprep.subr.bf16.mxu1 %v3001_v26  ;;  %1747 = vmatmul.mubr.f32.vlgmr.msra.gmra.mrb[112].mxu1 %v3555_v21  ;;  %v1759_v21 = vld [vmem:[%s3982_s6 + $0x38] sm:$0xff] }
 0x2c0   :  { %2810 = vmatpush3.bf16.msra.mxu1 %v2809_v20  ;;  %2618 = vmatprep.mubr.msk.f32.mxu1 %vm2998_vm1, %v2997_v1  ;;  %v2818_v30 = vpack.c.bf16 %v1759_v21, %v1758_v2  ;;  %v1875_v20 = vld [vmem:[%s3984_s8 + $0x70] sm:$0xff]  ;;  %v1962_v2 = vld [vmem:[%s3986_s10 + $0x8] sm:$0xff]  ;;  %v1980_v21 = vld [vmem:[%s3986_s10 + $0x98] sm:$0xff] }
 0x2c1   :  { %2811 = vmatprep.subr.bf16.mxu1 %v3001_v26  ;;  %v2854_v29 = vpack.c.bf16 %v1876_v45, %v1875_v20 }
 0x2c4   :  { %2813 = vmatpush3.bf16.msra.mxu1 %v2812_v12  ;;  %v1977_v12 = vld [vmem:[%s3986_s10 + $0x80] sm:$0xff] }
 0x2c5   :  { %2814 = vmatprep.subr.bf16.mxu1 %v3001_v26 }
 0x2c8   :  { %2816 = vmatpush3.bf16.msra.mxu1 %v2815_v32  ;;  %v2856_v32 = vpack.c.bf16 %v1978_v37, %v1977_v12 }
 0x2c9   :  { %2817 = vmatprep.subr.bf16.mxu1 %v3001_v26 }
 0x2ca   :  { %2857 = vmatprep.subr.bf16.mxu0 %v2856_v32 }
 0x2cc   :  { %2819 = vmatpush3.bf16.msra.mxu1 %v2818_v30  ;;  %v2858_v30 = vpack.c.bf16 %v1962_v2, %v1961_v6 }
 0x2cd   :  { %2820 = vmatprep.subr.bf16.mxu1 %v3001_v26 }
 0x2ce   :  { %2859 = vmatpush3.bf16.msra.mxu0 %v2858_v30 }
 0x2d0   :  { %2822 = vmatpush3.bf16.msra.mxu1 %v2821_v59  ;;  %v1964_v59 = vld [vmem:[%s3986_s10 + $0x18] sm:$0xff] }
 0x2d1   :  { %2823 = vmatprep.subr.bf16.mxu1 %v3001_v26 }
 0x2d4   :  { %2825 = vmatpush3.bf16.msra.mxu1 %v2824_v34  ;;  %v2862_v34 = vpack.c.bf16 %v1964_v59, %v1963_v60 }
 0x2d5   :  { %2826 = vmatprep.subr.bf16.mxu1 %v3001_v26 }
 0x2d8   :  { %2828 = vmatpush3.bf16.msra.mxu1 %v2827_v40  ;;  %v1966_v40 = vld [vmem:[%s3986_s10 + $0x28] sm:$0xff] }
 0x2d9   :  { %2829 = vmatprep.subr.bf16.mxu1 %v3001_v26 }
 0x2dc   :  { %2831 = vmatpush3.bf16.msra.mxu1 %v2830_v31  ;;  %v2866_v31 = vpack.c.bf16 %v1966_v40, %v1965_v24 }
 0x2dd   :  { %2832 = vmatprep.subr.bf16.mxu1 %v3001_v26 }
 0x350   :  { %v1607_v10 = vpop.f32.mrb[108].mxu1 }
 0x351   :  { %2619 = vmatmul.mubr.f32.vlgmr.msra.gmra.mrb[114].mxu1 %v1607_v10  ;;  %v3784_v48 = vpop.f32.mrb[109].mxu1  ;;  %v2868_v10 = vpack.c.bf16 %v1984_v51, %v1983_v16 }
 0x352   :  { %2653 = vmatprep.mubr.msk.f32.mxu1 %vm2998_vm1, %v2997_v1  ;;  %2834 = vmatpush3.bf16.msra.mxu1 %v2833_v4  ;;  %v1972_v4 = vld [vmem:[%s3986_s10 + $0x58] sm:$0xff] }
 0x353   :  { %2835 = vmatprep.subr.bf16.mxu1 %v3001_v26  ;;  %v2878_v5 = vpack.c.bf16 %v1972_v4, %v1971_v0 }
 0x356   :  { %2837 = vmatpush3.bf16.msra.mxu1 %v2836_v7  ;;  %v1989_v7 = vld [vmem:[%s3986_s10 + $0xe0] sm:$0xff] }
 0x357   :  { %2838 = vmatprep.subr.bf16.mxu1 %v3001_v26 }
 0x35a   :  { %2840 = vmatpush3.bf16.msra.mxu1 %v2839_v13  ;;  %v2880_v13 = vpack.c.bf16 %v1990_v9, %v1989_v7 }
 0x35b   :  { %2841 = vmatprep.subr.bf16.mxu1 %v3001_v26 }
 0x35e   :  { %2843 = vmatpush3.bf16.msra.mxu1 %v2842_v17  ;;  %v1992_v17 = vld [vmem:[%s3986_s10 + $0xf8] sm:$0xff] }
 0x35f   :  { %2844 = vmatprep.subr.bf16.mxu1 %v3001_v26  ;;  %v2884_v19 = vpack.c.bf16 %v1992_v17, %v1991_v15 }
 0x362   :  { %2846 = vmatpush3.bf16.msra.mxu1 %v2845_v52  ;;  %v1975_v52 = vld [vmem:[%s3986_s10 + $0x70] sm:$0xff] }
 0x363   :  { %2847 = vmatprep.subr.bf16.mxu1 %v3001_v26 }
 0x366   :  { %2849 = vmatpush3.bf16.msra.mxu1 %v2848_v27 }
 0x367   :  { %2850 = vmatprep.subr.bf16.mxu1 %v3001_v26 }
 0x36a   :  { %2852 = vmatpush3.bf16.msra.mxu1 %v2851_v63  ;;  %v1959_v63 = vmul.f32 196.0, %v3784_v48 }
 0x36b   :  { %2853 = vmatprep.subr.bf16.mxu1 %v3001_v26  ;;  %v1979_v26 = vld [vmem:[%s3986_s10 + $0x90] sm:$0xff] }
 0x36c   :  { %v2860_v61 = vpack.c.bf16 %v1980_v21, %v1979_v26 }
 0x36e   :  { %2855 = vmatpush3.bf16.msra.mxu1 %v2854_v29  ;;  %2861 = vmatprep.subr.bf16.mxu0 %v2860_v61 }
 0x36f   :  { %2863 = vmatpush3.bf16.msra.mxu0 %v2862_v34 }
 0x370   :  { %v2304_v25 = vpop.f32.mrb[110].mxu1  ;;  %2865 = vmatprep.subr.bf16.mxu0 %v2864_v8 }
 0x371   :  { %v2305_v39 = vpop.f32.mrb[111].mxu1 }
 0x372   :  { %v2306_v47 = vadd.f32 %v2305_v39, %v2304_v25  ;;  %v1967_v25 = vld [vmem:[%s3986_s10 + $0x30] sm:$0xff]  ;;  %v1968_v39 = vld [vmem:[%s3986_s10 + $0x38] sm:$0xff] }
 0x373   :  { %2867 = vmatpush3.bf16.msra.mxu0 %v2866_v31 }
 0x374   :  { %2869 = vmatprep.subr.bf16.mxu0 %v2868_v10 }
 0x392   :  { %v1748_v42 = vpop.f32.mrb[112].mxu1 }
 0x393   :  { %v1749_v43 = vadd.f32 %v2306_v47, %v1748_v42  ;;  %v1750_v44 = vpop.f32.mrb[113].mxu1  ;;  %v1985_v47 = vld [vmem:[%s3986_s10 + $0xc0] sm:$0xff]  ;;  %v1986_v42 = vld [vmem:[%s3986_s10 + $0xc8] sm:$0xff] }
 0x394   :  { %v2872_v44 = vpack.c.bf16 %v1986_v42, %v1985_v47 }
 0x395   :  { %2064 = vmatprep.mubr.f32.mxu0 %v1749_v43  ;;  %v2870_v43 = vpack.c.bf16 %v1968_v39, %v1967_v25 }
 0x397   :  { %2871 = vmatpush3.bf16.msra.mxu0 %v2870_v43 }
 0x398   :  { %2873 = vmatprep.subr.bf16.mxu0 %v2872_v44 }
 0x424   :  { %v1841_v50 = vpop.f32.mrb[114].mxu1 }
 0x425   :  { %v1842_v53 = vadd.f32 %v2214_v49, %v1841_v50  ;;  %v2620_v54 = vpop.f32.mrb[115].mxu1  ;;  %v1970_v49 = vld [vmem:[%s3986_s10 + $0x48] sm:$0xff] }
 0x426   :  { %v2874_v50 = vpack.c.bf16 %v1970_v49, %v1969_v46 }
 0x427   :  { %1845 = vst [vmem:[#allocation2] sm:$0x3] %v1842_v53  ;;  %v1849_v56 = vsel %vm1848_vm5, %v1842_v53, -1e+30 }
 0x428   :  { %v1850_v1 = vsel %vm302_vm0, %v1849_v56, -inf  ;;  %2875 = vmatpush3.bf16.msra.mxu0 %v2874_v50 }
 0x429   :  { %1851 = vmax.xlane.f32.xlu0 %v1850_v1  ;;  %v1987_v1 = vld [vmem:[%s3986_s10 + $0xd0] sm:$0xff] }
 0x42a   :  { %v2876_v23 = vpack.c.bf16 %v1988_v58, %v1987_v1 }
 0x42c   :  { %2877 = vmatprep.subr.bf16.mxu0 %v2876_v23 }
 0x42d   :  { %2879 = vmatpush3.bf16.msra.mxu0 %v2878_v5 }
 0x42e   :  { %2881 = vmatprep.subr.bf16.mxu0 %v2880_v13 }
 0x431   :  { %2883 = vmatpush3.bf16.msra.mxu0 %v2882_v18 }
 0x432   :  { %2885 = vmatprep.subr.bf16.mxu0 %v2884_v19 }
 0x4b6   :  { %v1852_v22 = vpop.xlane.xlu0 %1851 }
 0x4b7   :  { %v1853_v41 = vsub.f32 %v1849_v56, %v1852_v22  ;;  %v1976_v22 = vld [vmem:[%s3986_s10 + $0x78] sm:$0xff]  ;;  %s3002_s10 = smov [#allocation2]  }
 0x4b8   :  { %s2077_s17 = sshll.u32 %s3002_s10, 4  ;;  %s2078_s17 = int_to_ptr.vmem [resolvable:$true] %s2077_s17 }
 0x4b9   :  { %v1854_v62 = vmul.f32 1.442695, %v1853_v41  ;;  %v2886_v41 = vpack.c.bf16 %v1976_v22, %v1975_v52  ;;  %s2949_s18 = scalar_lea.vmem %s2078_s17, 32  ;;  %p2954_p1 = scmp.lt.s32.totalorder %s2078_s17, %s2078_s17 }
 0x4ba   :  { %p2950_p0 = scmp.ne.s32.totalorder %s2078_s17, %s2949_s18  ;;  %p2955_p2 = scmp.lt.s32.totalorder %s2949_s18, %s2949_s18 }
 0x4bb   :  { %2941 = vpow2.f32 %v1854_v62  ;;  %2887 = vmatpush3.bf16.msra.mxu0 %v2886_v41  ;;  %v2215_v62 = vld [vmem:[%s3985_s9] ss:$0 sm:$0xff] }
 0x4bc   :  { %p2956_p3 = por %p2955_p2, %p2954_p1 }
 0x4be   :  { %p2957_p4 = pnand %p2956_p3, %p2950_p0 }
 0x4c5   :  { %v2942_v33 = vpop.eup %2941 }
 0x4c6   :  { %v1856_v35 = vsel %vm302_vm0, %v2942_v33, 0.0 }
 0x4c7   :  { %1857 = vadd.xlane.f32.xlu0 %v1856_v35 }
 0x554   :  { %v1858_v53 = vpop.xlane.xlu0 %1857 }
 0x555   :  { %2943 = vrcp.f32 %v1858_v53 }
 0x55f   :  { %v2944_v54 = vpop.eup %2943 }
 0x560   :  { %v1860_v56 = vmul.f32 %v2944_v54, %v2942_v33 }
 0x562   :  { %2654 = vmatmul.mubr.f32.vlgmr.msra.gmra.mrb[116].mxu1 %v1860_v56 }
 0x635   :  { %v1950_v33 = vpop.f32.mrb[116].mxu1 }
 0x636   :  { %v1951_v35 = vadd.f32 %v2215_v62, %v1950_v33  ;;  %v2655_v36 = vpop.f32.mrb[117].mxu1 }
 0x638   :  { %v1954_v38 = vsub.f32 0.0, %v1951_v35 }
 0x63a   :  { %v1955_v27 = vmul.f32 1.442695, %v1954_v38 }
 0x63c   :  { %2945 = vpow2.f32 %v1955_v27 }
 0x646   :  { %v2946_v55 = vpop.eup %2945 }
 0x647   :  { %v1957_v57 = vadd.f32 1.0, %v2946_v55 }
 0x649   :  { %2947 = vrcp.f32 %v1957_v57 }
 0x653   :  { %v2948_v20 = vpop.eup %2947 }
 0x654   :  { %v1960_v45 = vmul.f32 %v2948_v20, %v1959_v63 }
 0x656   :  { %2065 = vmatmul.mubr.f32.vlgmr.msra.gmra.mrb[192].mxu0 %v1960_v45 }
 0x657   :  { %2960 = shalt.err (!%p2957_p4)
}
 0x658   :  { %s2961_s6 = scalar_lea.hbm %s3988_s12, 32 }
 0x659   :  { %p2962_p5 = scmp.ne.s32.totalorder %s3988_s12, %s2961_s6  ;;  %p2965_p6 = scmp.lt.u32.totalorder %s2961_s6, %s3988_s12 }
 0x65b   :  { %p2967_p7 = pnand %p2965_p6, %p2962_p5 }
 0x65d   :  { %2970 = shalt.err (!%p2967_p7)
}
 0x65e   :  { %2080 = dma.vmem_to_hbm [thread:$0]  %s2078_s17, 32, %s3988_s12, [#allocation3]   ;;  %v2216_v12 = vld [vmem:[%s3987_s11] ss:$0 sm:$0xff] }
 0x65f   :  { %s3003_s3 = smov [#allocation4]  }
 0x660   :  { %s2087_s27 = sshll.u32 %s3003_s3, 4  ;;  %s2088_s27 = int_to_ptr.vmem [resolvable:$true] %s2087_s27 }
 0x661   :  { %s2971_s28 = scalar_lea.vmem %s2088_s27, 32  ;;  %p2976_p9 = scmp.lt.s32.totalorder %s2088_s27, %s2088_s27 }
 0x662   :  { %p2972_p8 = scmp.ne.s32.totalorder %s2088_s27, %s2971_s28  ;;  %p2977_p10 = scmp.lt.s32.totalorder %s2971_s28, %s2971_s28 }
 0x664   :  { %p2978_p11 = por %p2977_p10, %p2976_p9 }
 0x666   :  { %p2979_p12 = pnand %p2978_p11, %p2972_p8 }
 0x729   :  { %v2373_v48 = vpop.f32.mrb[192].mxu0 }
 0x72a   :  { %v2374_v29 = vpop.f32.mrb[193].mxu0 }
 0x72b   :  { %v2375_v37 = vadd.f32 %v2374_v29, %v2373_v48 }
 0x72d   :  { %v2067_v6 = vadd.f32 %v2375_v37, %v2216_v12 }
 0x72f   :  { %2070 = vst [vmem:[#allocation4] sm:$0x3] %v2067_v6 }
 0x730   :  { %2982 = shalt.err (!%p2979_p12)
}
 0x731   :  { %s2983_s2 = scalar_lea.hbm %s3989_s13, 32 }
 0x732   :  { %p2984_p13 = scmp.ne.s32.totalorder %s3989_s13, %s2983_s2  ;;  %p2987_p0 = scmp.lt.u32.totalorder %s2983_s2, %s3989_s13 }
 0x734   :  { %p2989_p1 = pnand %p2987_p0, %p2984_p13 }
 0x736   :  { %2992 = shalt.err (!%p2989_p1)
}
 0x737   :  { %2090 = dma.vmem_to_hbm [thread:$0]  %s2088_s27, 32, %s3989_s13, [#allocation5]  }
 0x738   :  { %2993 = dma.done.wait [#allocation3], 32  }
 0x739   :  { %2994 = vsyncadd [#allocation3], 4294967264 }
 0x73a   :  { %2995 = dma.done.wait [#allocation5], 32  }
 0x73b   :  { %2996 = vsyncadd [#allocation5], 4294967264 }
 0x73c   :  { %2097 = vsyncpa [#allocation3], 1 }
 0x73d   :  { %2098 = vsyncpa [#allocation5], 1 }

</bundles_post_ra>
